<compile_context>
chip_gen: v7x
topology: tpu7x:2x2x1
jax: 0.10.0
libtpu: 0.0.40
codegen_flags: <defaults>
</compile_context>

<pallas_src>
import numpy as np
import jax
import jax.numpy as jnp
from jax.experimental import pallas as pl
from jax.experimental.pallas import tpu as pltpu


# ----------------------------- Pallas kernel --------------------------------
def aux_head_kernel(x_ref, w1_ref, b1_ref, w2_ref, b2_ref, wc_ref, bc_ref,
                    out_ref):
    # ReLU on the incoming bf16 feature map, upcast to f32 for the pooling
    # sums (v5e has no bf16 VALU; on v6e/v7x a bf16 sum path is also valid
    # within the accuracy contract, but f32 is safe everywhere).
    x = jnp.maximum(x_ref[...].astype(jnp.float32), 0.0)    # (TN, 8, 8, C)

    # Separable AvgPool2d(5, stride=3, padding=0): 8x8 -> 2x2.
    # Row groups {0..4} and {3..7}; column groups 0-2 / 3-4 / 5-7 are shared
    # between the two horizontal taps.  The 1/25 divisor + BN1 scale live
    # inside w1, so only raw window sums are needed here.
    h1_parts = []
    for ph in (0, 1):
        rsum = jnp.sum(x[:, 3 * ph:3 * ph + 5, :, :], axis=1)   # (TN, 8, C)
        col_a = jnp.sum(rsum[:, 0:3, :], axis=1)                # cols 0-2
        col_b = jnp.sum(rsum[:, 3:5, :], axis=1)                # cols 3-4
        col_c = jnp.sum(rsum[:, 5:8, :], axis=1)                # cols 5-7
        for tap in (col_a + col_b, col_b + col_c):              # pw = 0, 1
            h1_parts.append(
                jnp.dot(tap.astype(w1_ref.dtype), w1_ref[...],
                        preferred_element_type=jnp.float32))    # (TN, 128)

    # Lane-concatenate the 4 taps -> (TN, 512); column index = p*128 + k with
    # p = ph*2 + pw, matching the (512, 768) conv2 weight layout.
    h1 = jnp.concatenate(h1_parts, axis=1)                   # (TN, 512) f32
    h1 = jnp.maximum(h1 + b1_ref[...], 0.0)                  # BN1 bias + ReLU

    # Conv2d(128, 768, 2) on the 2x2 map == one fused K=512 MXU matmul.
    h2 = jnp.dot(h1.astype(w2_ref.dtype), w2_ref[...],
                 preferred_element_type=jnp.float32)         # (TN, 768)
    h2 = jnp.maximum(h2 + b2_ref[...], 0.0)                  # BN2 bias + ReLU

    # Linear(768, num_classes), lane-padded to a multiple of 128 columns.
    out = jnp.dot(h2.astype(wc_ref.dtype), wc_ref[...],
                  preferred_element_type=jnp.float32) + bc_ref[...]
    out_ref[...] = out                                       # (TN, NC_PAD)


# ------------------------------- wrapper -------------------------------------
def _pick_tn(N, H, W, C):
    """Batch tile: <=128, sublane multiple of 8, bf16 x tile <= ~16 MiB per
    buffer, and grid length >= 2 when N allows (so v7x's 2 TCs both work)."""
    if N <= 8:
        return N                               # full-dim block (grid of 1)
    row_bytes = H * W * C * 2                  # bf16 bytes per batch row
    tn_cap = max(8, min(128, (16 * 1024 * 1024) // max(row_bytes, 1)))
    tn = min(N, tn_cap)
    tn = max(8, (tn // 8) * 8)                 # sublane multiple
    if pl.cdiv(N, tn) < 2:                     # force >= 2 grid steps (v7x)
        half = -(-N // 2)
        tn = max(8, ((half + 7) // 8) * 8)
    return tn


def aux_head_pallas(x_nchw, params, num_classes):
    """x_nchw: (N, C, 8, 8) float32 (PyTorch layout)."""
    N, C, H, W = x_nchw.shape
    assert (H, W) == (8, 8), "CIFAR auxiliary head expects 8x8 feature maps"
    nc_pad = params["wc"].shape[1]

    TN = _pick_tn(N, H, W, C)
    grid = (pl.cdiv(N, TN),)
    # Note: if N % TN != 0 the last step reads garbage batch rows; rows are
    # independent through every matmul, so valid outputs are unaffected.

    # Cast to bf16 FIRST so the layout change moves half the bytes; under jit
    # the cast+transpose fuse (ideally the producer would emit NHWC bf16).
    x_nhwc = jnp.transpose(x_nchw.astype(jnp.bfloat16), (0, 2, 3, 1))

    # VMEM budget: double-buffered x/out tiles + weights (+ slack), capped at
    # 48 MiB so it also fits v7x's 64 MiB physical VMEM with headroom.
    x_tile_bytes = TN * H * W * C * 2
    out_tile_bytes = TN * nc_pad * 4
    weight_bytes = sum(int(np.prod(params[k].shape)) * params[k].dtype.itemsize
                       for k in ("w1", "b1", "w2", "b2", "wc", "bc"))
    vmem_limit = 2 * (x_tile_bytes + out_tile_bytes) + 2 * weight_bytes
    vmem_limit = int(min(max(vmem_limit + (8 << 20), 16 << 20), 48 << 20))

    # Weight/bias blocks have constant index_maps so they are fetched once and
    # stay resident across the batch grid.
    # TODO(synk): pipeline_mode=pl.Buffered(1) on the weight specs would
    #             reclaim their second buffer (~2 MB); skipped for safety.
    out_padded = pl.pallas_call(
        aux_head_kernel,
        out_shape=jax.ShapeDtypeStruct((N, nc_pad), jnp.float32),
        grid=grid,
        in_specs=[
            pl.BlockSpec((TN, H, W, C), lambda i: (i, 0, 0, 0)),   # x tile
            pl.BlockSpec((C, 128), lambda i: (0, 0)),              # w1 (folded)
            pl.BlockSpec((1, 512), lambda i: (0, 0)),              # b1 (tiled)
            pl.BlockSpec((512, 768), lambda i: (0, 0)),            # w2 (folded)
            pl.BlockSpec((1, 768), lambda i: (0, 0)),              # b2
            pl.BlockSpec((768, nc_pad), lambda i: (0, 0)),         # wc (padded)
            pl.BlockSpec((1, nc_pad), lambda i: (0, 0)),           # bc (padded)
        ],
        out_specs=pl.BlockSpec((TN, nc_pad), lambda i: (i, 0)),
        compiler_params=pltpu.CompilerParams(
            dimension_semantics=("parallel",),
            vmem_limit_bytes=vmem_limit),
    )(x_nhwc, params["w1"], params["b1"], params["w2"], params["b2"],
      params["wc"], params["bc"])

    return out_padded[:, :num_classes]


aux_head_pallas_jit = jax.jit(aux_head_pallas, static_argnums=(2,))


# ----------------------------- parameter setup ------------------------------
def make_params(key, C, num_classes, eps=1e-5):
    ks = jax.random.split(key, 12)

    # Torch-layout parameters.
    w1_t = jax.random.normal(ks[0], (128, C), jnp.float32) * 0.1      # conv1
    g1 = jax.random.uniform(ks[1], (128,), jnp.float32, 0.5, 1.5)
    be1 = jax.random.normal(ks[2], (128,), jnp.float32) * 0.1
    rm1 = jax.random.normal(ks[3], (128,), jnp.float32) * 0.1
    rv1 = jax.random.uniform(ks[4], (128,), jnp.float32, 0.5, 1.5)
    s1 = g1 / jnp.sqrt(rv1 + eps)
    b1 = be1 - rm1 * s1

    w2_t = jax.random.normal(ks[5], (768, 128, 2, 2), jnp.float32) * 0.05
    g2 = jax.random.uniform(ks[6], (768,), jnp.float32, 0.5, 1.5)
    be2 = jax.random.normal(ks[7], (768,), jnp.float32) * 0.1
    rm2 = jax.random.normal(ks[8], (768,), jnp.float32) * 0.1
    rv2 = jax.random.uniform(ks[9], (768,), jnp.float32, 0.5, 1.5)
    s2 = g2 / jnp.sqrt(rv2 + eps)
    b2 = be2 - rm2 * s2

    wc_t = jax.random.normal(ks[10], (num_classes, 768), jnp.float32) * 0.05
    bc_t = jax.random.normal(ks[11], (num_classes,), jnp.float32) * 0.1

    # Kernel-layout parameters (BN + 1/25 pooling factor folded, bf16 MXU
    # weights, lane-padded classifier).
    nc_pad = ((num_classes + 127) // 128) * 128

    w1 = (w1_t.T * s1[None, :] * (1.0 / 25.0)).astype(jnp.bfloat16)   # (C,128)
    b1_tiled = jnp.tile(b1, 4).reshape(1, 512)                        # f32

    # (O, Cin, KH, KW) -> (KH, KW, Cin, O) -> (512, 768): row = (kh*2+kw)*128+c
    w2_flat = jnp.transpose(w2_t, (2, 3, 1, 0)).reshape(512, 768)
    w2 = (w2_flat * s2[None, :]).astype(jnp.bfloat16)
    b2_row = b2.reshape(1, 768)                                       # f32

    wc = jnp.zeros((768, nc_pad), jnp.float32).at[:, :num_classes].set(
        wc_t.T).astype(jnp.bfloat16)
    bc = jnp.zeros((1, nc_pad), jnp.float32).at[0, :num_classes].set(bc_t)

    params = dict(w1=w1, b1=b1_tiled, w2=w2, b2=b2_row, wc=wc, bc=bc)
    torch_layout = dict(w1_t=w1_t, w2_t=w2_t, wc_t=wc_t, bc_t=bc_t,
                        s1=s1, b1=b1, s2=s2, b2=b2)
    return params, torch_layout


# ------------------------- pure-JAX reference (NCHW) ------------------------
def reference(x_nchw, tl):
    N, C, H, W = x_nchw.shape
    x = jnp.maximum(x_nchw, 0.0)
    pool = jnp.zeros((N, C, 2, 2), jnp.float32)
    for ph in range(2):
        for pw in range(2):
            win = x[:, :, 3 * ph:3 * ph + 5, 3 * pw:3 * pw + 5]
            pool = pool.at[:, :, ph, pw].set(jnp.mean(win, axis=(2, 3)))
    h1 = jnp.einsum("nchw,kc->nkhw", pool, tl["w1_t"],
                    precision=jax.lax.Precision.HIGHEST)
    h1 = jnp.maximum(h1 * tl["s1"][None, :, None, None]
                     + tl["b1"][None, :, None, None], 0.0)
    h2 = jnp.einsum("nchw,ochw->no", h1, tl["w2_t"],
                    precision=jax.lax.Precision.HIGHEST)
    h2 = jnp.maximum(h2 * tl["s2"][None, :] + tl["b2"][None, :], 0.0)
    out = jnp.dot(h2, tl["wc_t"].T,
                  precision=jax.lax.Precision.HIGHEST) + tl["bc_t"][None, :]
    return out


# ---------------------------------- main -------------------------------------
if __name__ == "__main__":
    # Lane-dense C (multiple of 128) and N large enough for a 2-step grid.
    N, C, H, W = 16, 128, 8, 8        # CIFAR aux head sees 8x8 feature maps
    num_classes = 10

    key = jax.random.PRNGKey(0)
    kx, kp = jax.random.split(key)
    x = jax.random.normal(kx, (N, C, H, W), jnp.float32)

    params, torch_layout = make_params(kp, C, num_classes)

    out = jax.block_until_ready(aux_head_pallas_jit(x, params, num_classes))
    ref = jax.block_until_ready(reference(x, torch_layout))

    # bf16 activations + bf16 MXU weights with f32 accumulation -> relaxed
    # tolerance (stated accuracy contract for the inference logits).
    np.testing.assert_allclose(np.asarray(out), np.asarray(ref),
                               rtol=3e-2, atol=3e-2)

    assert out.shape == (N, num_classes)
    print("KERNEL_OK")
</pallas_src>

<mosaic_0001>
module attributes {stable_mosaic.version = 11 : i64} {
  func.func @aux_head_kernel(%arg0: i32, %arg1: memref<8x8x8x128xbf16, #tpu.memory_space<vmem>>, %arg2: memref<128x128xbf16, #tpu.memory_space<vmem>>, %arg3: memref<1x512xf32, #tpu.memory_space<vmem>>, %arg4: memref<512x768xbf16, #tpu.memory_space<vmem>>, %arg5: memref<1x768xf32, #tpu.memory_space<vmem>>, %arg6: memref<768x128xbf16, #tpu.memory_space<vmem>>, %arg7: memref<1x128xf32, #tpu.memory_space<vmem>>, %arg8: memref<8x128xf32, #tpu.memory_space<vmem>>) attributes {dimension_semantics = [#tpu.dimension_semantics<parallel>], iteration_bounds = array<i64: 2>, scalar_prefetch = 0 : i64, scratch_operands = 0 : i64, tpu.core_type = #tpu.core_type<tc>, window_params = [{transform_indices = @transform_0, window_bounds = array<i64: 8, 8, 8, 128>}, {pipeline_mode = #tpu.pipeline_mode<synchronous>, transform_indices = @transform_1, window_bounds = array<i64: 128, 128>}, {pipeline_mode = #tpu.pipeline_mode<synchronous>, transform_indices = @transform_2, window_bounds = array<i64: 1, 512>}, {pipeline_mode = #tpu.pipeline_mode<synchronous>, transform_indices = @transform_3, window_bounds = array<i64: 512, 768>}, {pipeline_mode = #tpu.pipeline_mode<synchronous>, transform_indices = @transform_4, window_bounds = array<i64: 1, 768>}, {pipeline_mode = #tpu.pipeline_mode<synchronous>, transform_indices = @transform_5, window_bounds = array<i64: 768, 128>}, {pipeline_mode = #tpu.pipeline_mode<synchronous>, transform_indices = @transform_6, window_bounds = array<i64: 1, 128>}, {transform_indices = @transform_7, window_bounds = array<i64: 8, 128>}]} {
    %c0 = arith.constant 0 : index
    %c0_0 = arith.constant 0 : index
    %c0_1 = arith.constant 0 : index
    %c0_2 = arith.constant 0 : index
    %0 = vector.load %arg1[%c0, %c0_0, %c0_1, %c0_2] : memref<8x8x8x128xbf16, #tpu.memory_space<vmem>>, vector<8x8x8x128xbf16>
    %1 = arith.extf %0 : vector<8x8x8x128xbf16> to vector<8x8x8x128xf32>
    %cst = arith.constant 0.000000e+00 : f32
    %2 = vector.broadcast %cst : f32 to vector<8x8x8x128xf32>
    %3 = arith.maximumf %1, %2 : vector<8x8x8x128xf32>
    %4 = vector.extract_strided_slice %3 {offsets = [0, 0, 0, 0], sizes = [8, 5, 8, 128], strides = [1, 1, 1, 1]} : vector<8x8x8x128xf32> to vector<8x5x8x128xf32>
    %cst_3 = arith.constant dense<0.000000e+00> : vector<8x8x128xf32>
    %5 = vector.multi_reduction <add>, %4, %cst_3 [1] : vector<8x5x8x128xf32> to vector<8x8x128xf32>
    %6 = vector.extract_strided_slice %5 {offsets = [0, 0, 0], sizes = [8, 3, 128], strides = [1, 1, 1]} : vector<8x8x128xf32> to vector<8x3x128xf32>
    %cst_4 = arith.constant dense<0.000000e+00> : vector<8x128xf32>
    %7 = vector.multi_reduction <add>, %6, %cst_4 [1] : vector<8x3x128xf32> to vector<8x128xf32>
    %8 = vector.extract_strided_slice %5 {offsets = [0, 3, 0], sizes = [8, 2, 128], strides = [1, 1, 1]} : vector<8x8x128xf32> to vector<8x2x128xf32>
    %cst_5 = arith.constant dense<0.000000e+00> : vector<8x128xf32>
    %9 = vector.multi_reduction <add>, %8, %cst_5 [1] : vector<8x2x128xf32> to vector<8x128xf32>
    %10 = vector.extract_strided_slice %5 {offsets = [0, 5, 0], sizes = [8, 3, 128], strides = [1, 1, 1]} : vector<8x8x128xf32> to vector<8x3x128xf32>
    %cst_6 = arith.constant dense<0.000000e+00> : vector<8x128xf32>
    %11 = vector.multi_reduction <add>, %10, %cst_6 [1] : vector<8x3x128xf32> to vector<8x128xf32>
    %12 = arith.addf %7, %9 : vector<8x128xf32>
    %13 = arith.addf %9, %11 : vector<8x128xf32>
    %14 = arith.truncf %12 : vector<8x128xf32> to vector<8x128xbf16>
    %c0_7 = arith.constant 0 : index
    %c0_8 = arith.constant 0 : index
    %15 = vector.load %arg2[%c0_7, %c0_8] : memref<128x128xbf16, #tpu.memory_space<vmem>>, vector<128x128xbf16>
    %cst_9 = arith.constant dense<0.000000e+00> : vector<8x128xf32>
    %16 = tpu.matmul %14, %15, %cst_9 {dimension_numbers = #tpu.dot_dimension_numbers<[1], [0], [0], [1], [0, 0, 1, 1], [], []>} : vector<8x128xbf16>, vector<128x128xbf16>, vector<8x128xf32> -> vector<8x128xf32>
    %17 = arith.truncf %13 : vector<8x128xf32> to vector<8x128xbf16>
    %c0_10 = arith.constant 0 : index
    %c0_11 = arith.constant 0 : index
    %18 = vector.load %arg2[%c0_10, %c0_11] : memref<128x128xbf16, #tpu.memory_space<vmem>>, vector<128x128xbf16>
    %cst_12 = arith.constant dense<0.000000e+00> : vector<8x128xf32>
    %19 = tpu.matmul %17, %18, %cst_12 {dimension_numbers = #tpu.dot_dimension_numbers<[1], [0], [0], [1], [0, 0, 1, 1], [], []>} : vector<8x128xbf16>, vector<128x128xbf16>, vector<8x128xf32> -> vector<8x128xf32>
    %20 = vector.extract_strided_slice %3 {offsets = [0, 3, 0, 0], sizes = [8, 5, 8, 128], strides = [1, 1, 1, 1]} : vector<8x8x8x128xf32> to vector<8x5x8x128xf32>
    %cst_13 = arith.constant dense<0.000000e+00> : vector<8x8x128xf32>
    %21 = vector.multi_reduction <add>, %20, %cst_13 [1] : vector<8x5x8x128xf32> to vector<8x8x128xf32>
    %22 = vector.extract_strided_slice %21 {offsets = [0, 0, 0], sizes = [8, 3, 128], strides = [1, 1, 1]} : vector<8x8x128xf32> to vector<8x3x128xf32>
    %cst_14 = arith.constant dense<0.000000e+00> : vector<8x128xf32>
    %23 = vector.multi_reduction <add>, %22, %cst_14 [1] : vector<8x3x128xf32> to vector<8x128xf32>
    %24 = vector.extract_strided_slice %21 {offsets = [0, 3, 0], sizes = [8, 2, 128], strides = [1, 1, 1]} : vector<8x8x128xf32> to vector<8x2x128xf32>
    %cst_15 = arith.constant dense<0.000000e+00> : vector<8x128xf32>
    %25 = vector.multi_reduction <add>, %24, %cst_15 [1] : vector<8x2x128xf32> to vector<8x128xf32>
    %26 = vector.extract_strided_slice %21 {offsets = [0, 5, 0], sizes = [8, 3, 128], strides = [1, 1, 1]} : vector<8x8x128xf32> to vector<8x3x128xf32>
    %cst_16 = arith.constant dense<0.000000e+00> : vector<8x128xf32>
    %27 = vector.multi_reduction <add>, %26, %cst_16 [1] : vector<8x3x128xf32> to vector<8x128xf32>
    %28 = arith.addf %23, %25 : vector<8x128xf32>
    %29 = arith.addf %25, %27 : vector<8x128xf32>
    %30 = arith.truncf %28 : vector<8x128xf32> to vector<8x128xbf16>
    %c0_17 = arith.constant 0 : index
    %c0_18 = arith.constant 0 : index
    %31 = vector.load %arg2[%c0_17, %c0_18] : memref<128x128xbf16, #tpu.memory_space<vmem>>, vector<128x128xbf16>
    %cst_19 = arith.constant dense<0.000000e+00> : vector<8x128xf32>
    %32 = tpu.matmul %30, %31, %cst_19 {dimension_numbers = #tpu.dot_dimension_numbers<[1], [0], [0], [1], [0, 0, 1, 1], [], []>} : vector<8x128xbf16>, vector<128x128xbf16>, vector<8x128xf32> -> vector<8x128xf32>
    %33 = arith.truncf %29 : vector<8x128xf32> to vector<8x128xbf16>
    %c0_20 = arith.constant 0 : index
    %c0_21 = arith.constant 0 : index
    %34 = vector.load %arg2[%c0_20, %c0_21] : memref<128x128xbf16, #tpu.memory_space<vmem>>, vector<128x128xbf16>
    %cst_22 = arith.constant dense<0.000000e+00> : vector<8x128xf32>
    %35 = tpu.matmul %33, %34, %cst_22 {dimension_numbers = #tpu.dot_dimension_numbers<[1], [0], [0], [1], [0, 0, 1, 1], [], []>} : vector<8x128xbf16>, vector<128x128xbf16>, vector<8x128xf32> -> vector<8x128xf32>
    %36 = tpu.concatenate %16, %19, %32, %35 in 1 : vector<8x128xf32>, vector<8x128xf32>, vector<8x128xf32>, vector<8x128xf32> -> vector<8x512xf32>
    %c0_23 = arith.constant 0 : index
    %c0_24 = arith.constant 0 : index
    %37 = vector.load %arg3[%c0_23, %c0_24] : memref<1x512xf32, #tpu.memory_space<vmem>>, vector<1x512xf32>
    %38 = vector.broadcast %37 : vector<1x512xf32> to vector<8x512xf32>
    %39 = arith.addf %36, %38 : vector<8x512xf32>
    %cst_25 = arith.constant 0.000000e+00 : f32
    %40 = vector.broadcast %cst_25 : f32 to vector<8x512xf32>
    %41 = arith.maximumf %39, %40 : vector<8x512xf32>
    %42 = arith.truncf %41 : vector<8x512xf32> to vector<8x512xbf16>
    %c0_26 = arith.constant 0 : index
    %c0_27 = arith.constant 0 : index
    %43 = vector.load %arg4[%c0_26, %c0_27] : memref<512x768xbf16, #tpu.memory_space<vmem>>, vector<512x768xbf16>
    %cst_28 = arith.constant dense<0.000000e+00> : vector<8x768xf32>
    %44 = tpu.matmul %42, %43, %cst_28 {dimension_numbers = #tpu.dot_dimension_numbers<[1], [0], [0], [1], [0, 0, 1, 1], [], []>} : vector<8x512xbf16>, vector<512x768xbf16>, vector<8x768xf32> -> vector<8x768xf32>
    %c0_29 = arith.constant 0 : index
    %c0_30 = arith.constant 0 : index
    %45 = vector.load %arg5[%c0_29, %c0_30] : memref<1x768xf32, #tpu.memory_space<vmem>>, vector<1x768xf32>
    %46 = vector.broadcast %45 : vector<1x768xf32> to vector<8x768xf32>
    %47 = arith.addf %44, %46 : vector<8x768xf32>
    %cst_31 = arith.constant 0.000000e+00 : f32
    %48 = vector.broadcast %cst_31 : f32 to vector<8x768xf32>
    %49 = arith.maximumf %47, %48 : vector<8x768xf32>
    %50 = arith.truncf %49 : vector<8x768xf32> to vector<8x768xbf16>
    %c0_32 = arith.constant 0 : index
    %c0_33 = arith.constant 0 : index
    %51 = vector.load %arg6[%c0_32, %c0_33] : memref<768x128xbf16, #tpu.memory_space<vmem>>, vector<768x128xbf16>
    %cst_34 = arith.constant dense<0.000000e+00> : vector<8x128xf32>
    %52 = tpu.matmul %50, %51, %cst_34 {dimension_numbers = #tpu.dot_dimension_numbers<[1], [0], [0], [1], [0, 0, 1, 1], [], []>} : vector<8x768xbf16>, vector<768x128xbf16>, vector<8x128xf32> -> vector<8x128xf32>
    %c0_35 = arith.constant 0 : index
    %c0_36 = arith.constant 0 : index
    %53 = vector.load %arg7[%c0_35, %c0_36] : memref<1x128xf32, #tpu.memory_space<vmem>>, vector<1x128xf32>
    %54 = vector.broadcast %53 : vector<1x128xf32> to vector<8x128xf32>
    %55 = arith.addf %52, %54 : vector<8x128xf32>
    %c0_37 = arith.constant 0 : index
    %c0_38 = arith.constant 0 : index
    %56 = vector.load %arg8[%c0_37, %c0_38] : memref<8x128xf32, #tpu.memory_space<vmem>>, vector<8x128xf32>
    tpu.vector_store %arg8[%c0_37, %c0_38], %55 {strides = array<i32>} : memref<8x128xf32, #tpu.memory_space<vmem>>, vector<8x128xf32>,
    return
  }
  func.func @transform_0(%arg0: i32) -> (i32, i32, i32, i32) {
    %c0_i32 = arith.constant 0 : i32
    %c0_i32_0 = arith.constant 0 : i32
    %c0_i32_1 = arith.constant 0 : i32
    %c0_i32_2 = arith.constant 0 : i32
    return %arg0, %c0_i32, %c0_i32_0, %c0_i32_1 : i32, i32, i32, i32
  }
  func.func @transform_1(%arg0: i32) -> (i32, i32) {
    %c0_i32 = arith.constant 0 : i32
    %c0_i32_0 = arith.constant 0 : i32
    %c0_i32_1 = arith.constant 0 : i32
    return %c0_i32, %c0_i32_0 : i32, i32
  }
  func.func @transform_2(%arg0: i32) -> (i32, i32) {
    %c0_i32 = arith.constant 0 : i32
    %c0_i32_0 = arith.constant 0 : i32
    %c0_i32_1 = arith.constant 0 : i32
    return %c0_i32, %c0_i32_0 : i32, i32
  }
  func.func @transform_3(%arg0: i32) -> (i32, i32) {
    %c0_i32 = arith.constant 0 : i32
    %c0_i32_0 = arith.constant 0 : i32
    %c0_i32_1 = arith.constant 0 : i32
    return %c0_i32, %c0_i32_0 : i32, i32
  }
  func.func @transform_4(%arg0: i32) -> (i32, i32) {
    %c0_i32 = arith.constant 0 : i32
    %c0_i32_0 = arith.constant 0 : i32
    %c0_i32_1 = arith.constant 0 : i32
    return %c0_i32, %c0_i32_0 : i32, i32
  }
  func.func @transform_5(%arg0: i32) -> (i32, i32) {
    %c0_i32 = arith.constant 0 : i32
    %c0_i32_0 = arith.constant 0 : i32
    %c0_i32_1 = arith.constant 0 : i32
    return %c0_i32, %c0_i32_0 : i32, i32
  }
  func.func @transform_6(%arg0: i32) -> (i32, i32) {
    %c0_i32 = arith.constant 0 : i32
    %c0_i32_0 = arith.constant 0 : i32
    %c0_i32_1 = arith.constant 0 : i32
    return %c0_i32, %c0_i32_0 : i32, i32
  }
  func.func @transform_7(%arg0: i32) -> (i32, i32) {
    %c0_i32 = arith.constant 0 : i32
    %c0_i32_0 = arith.constant 0 : i32
    return %arg0, %c0_i32 : i32, i32
  }
}

</mosaic_0001>

<bundles_post_ra>
// kernel: aux_head_pallas.1
= control target key start
LH: loop header
LB: loop body
LE: loop exit
PB: predicated region body
PF: predicated region fallthrough
CT: control target
= control target key end

     0   :  { %12 = vsyncpa [#allocation3], 0  ;;  %s6132_s0 = inlined_call_operand.vmem [shape: bf16[16,8,8,128], index: 0, kind: input, shape index: {}]   ;;  %s6133_s1 = inlined_call_operand.hbm [shape: bf16[128,128], index: 1, kind: input, shape index: {}]   ;;  %s6134_s2 = inlined_call_operand.vmem [shape: f32[1,512], index: 2, kind: input, shape index: {}]   ;;  %s6135_s3 = inlined_call_operand.vmem [shape: bf16[512,768], index: 3, kind: input, shape index: {}]   ;;  %s6136_s4 = inlined_call_operand.vmem [shape: f32[1,768], index: 4, kind: input, shape index: {}]   ;;  %s6137_s5 = inlined_call_operand.hbm [shape: bf16[768,128], index: 5, kind: input, shape index: {}]   ;;  %s6138_s6 = inlined_call_operand.vmem [shape: f32[1,128], index: 6, kind: input, shape index: {}]   ;;  %s6139_s7 = inlined_call_operand.hbm [shape: f32[16,128], index: 7, kind: output, shape index: {}]  }
   0x1   :  { %13 = vsyncpa [#allocation6], 0 }
   0x2   :  { %14 = vsyncpa [#allocation4], 0 }
   0x3   :  { %16 = vsyncpa [#allocation4 + $0x1], 0  ;;  %s4681_s24 = smov 0   ;;  %s4683_s25 = smov 0  }
   0x4   :  { %s4685_s26 = smov 0   ;;  %s4687_s27 = smov 0  }
   0x5 LB: > { %s4702_s28 = sadd.s32 4294967295, %s4632_s27   ;;  %s3465_s29 = sadd.s32 4294967294, %s4632_s27   ;;  %s4632_s27 = sphi %s4687_s27, %s6202_s27   ;;  %s4628_s26 = sphi %s4685_s26, %s6201_s26   ;;  %s4624_s25 = sphi %s4683_s25, %s6200_s25   ;;  %s4620_s24 = sphi %s4681_s24, %s6199_s24  }
   0x6   : > { %s4706_s30 = sadd.s32 1, %s4632_s27   ;;  %s181_s8 = sadd.s32 1, %s4628_s26 }
   0x7   : > { %s178_s9 = ssub.s32 %s4632_s27, %s4706_s30  ;;  %p191_p0 = scmp.ne.s32.totalorder %s4628_s26, %s4624_s25 }
   0x8   : > { %p179_p1 = scmp.eq.s32.totalorder %s178_s9, 0  ;;  %p192_p2 = scmp.eq.s32.totalorder %s4702_s28, 1 }
   0x9   : > { %p197_p3 = scmp.ne.s32.totalorder %s4624_s25, %s4620_s24  ;;  %p198_p4 = scmp.eq.s32.totalorder %s3465_s29, 1 }
   0xa   : > { %s4717_s10 = scalar_select %p179_p1, %s4628_s26, %s181_s8  }
   0xb   : > { %p4719_p5 = por %p192_p2, %p191_p0  ;;  %p4723_p6 = por %p198_p4, %p197_p3 }
   0xc   : > { %6152 = sst [smem:[#allocation11_spill]] %s4717_s10  ;;  %p3466_p7 = scmp.ge.s32.totalorder %s4632_s27, 1 }
   0xd   : > { %s6153_s11 = scalar_select %p4719_p5, 1, 0 }
   0xe   : > { %s6154_s12 = scalar_select %p4723_p6, 1, 0 }
   0xf   : > { %p205_p8 = scmp.lt.s32.totalorder %s4632_s27, 3  ;;  %p6140_p9 = scmp.eq.s32.totalorder %s4702_s28, 0 }
  0x10   : > { %s4634_s14 = smov [#allocation2]   ;;  %s4635_s17 = smov [#allocation5]  }
  0x11   : > { %p4730_p10 = pnand %p3466_p7, %p205_p8  ;;  %s217_s15 = sshll.u32 %s4634_s14, 4  ;;  %s218_s15 = int_to_ptr.vmem [resolvable:$true] %s217_s15 }
  0x12   : > { %s239_s18 = sshll.u32 %s4635_s17, 4  ;;  %s4506_s21 = scalar_lea.hbm %s6133_s1, 1024  ;;  %s4742_s18 = int_to_ptr.vmem [resolvable:$true] %s239_s18 }
  0x13   : > { %s6155_s13 = scalar_select %p4730_p10, 1, 0 }
  0x14   : > { %p4100_p11 = pneg %p4730_p10  ;;  %p4507_p13 = scmp.ne.s32.totalorder %s6133_s1, %s4506_s21 }
  0x15   : > { %p4513_p3 = scmp.lt.u32.totalorder %s4506_s21, %s6133_s1 }
  0x16   : > { %p4738_p12 = pnand %p6140_p9, %p4100_p11 }
  0x18   : > { %p4508_p0 = pneg %p4738_p12 }
  0x1a   : > { %p4509_p1 = pnand %p4508_p0, %p4507_p13 }
  0x1c   : > { %p4510_p2 = pneg %p4509_p1 }
  0x1e   : > { %p4515_p4 = pnand %p4513_p3, %p4510_p2 }
  0x20   : > { %4518 = shalt.err (!%p4515_p4)
}
  0x21   : > { %s4519_s9 = scalar_lea.vmem %s218_s15, 1024  ;;  %p4527_p9 = scmp.lt.s32.totalorder %s218_s15, %s218_s15 }
  0x22   : > { %p4520_p7 = scmp.ne.s32.totalorder %s218_s15, %s4519_s9  ;;  %p4528_p6 = scmp.lt.s32.totalorder %s4519_s9, %s4519_s9 }
  0x24   : > { %p4522_p8 = pnand %p4520_p7, %p4508_p0  ;;  %p4529_p5 = por %p4528_p6, %p4527_p9 }
  0x26   : > { %p4523_p11 = pneg %p4522_p8 }
  0x28   : > { %p4530_p10 = pnand %p4529_p5, %p4523_p11 }
  0x2a   : > { %4533 = shalt.err (!%p4530_p10)
}
  0x2b   : > { %s4636_s14 = smov 64   ;;  %s4637_s17 = smov 4  }
  0x2c   : > { %4103 = dma.hbm_to_vmem [thread:$0]  (!%p4738_p12), %s6133_s1, 1024, %s218_s15, [#allocation3], %s4636_s14, %s4636_s14, %s4637_s17  }
  0x2d   : > { %s4534_s23 = scalar_lea.hbm %s6137_s5, 6144 }
  0x2e   : > { %p4535_p13 = scmp.ne.s32.totalorder %s6137_s5, %s4534_s23  ;;  %p4541_p9 = scmp.lt.u32.totalorder %s4534_s23, %s6137_s5 }
  0x30   : > { %p4537_p5 = pnand %p4535_p13, %p4508_p0 }
  0x32   : > { %p4538_p6 = pneg %p4537_p5 }
  0x34   : > { %p4543_p10 = pnand %p4541_p9, %p4538_p6 }
  0x36   : > { %4546 = shalt.err (!%p4543_p10)
}
  0x37   : > { %s4547_s15 = scalar_lea.vmem %s4742_s18, 6144  ;;  %p4555_p4 = scmp.lt.s32.totalorder %s4742_s18, %s4742_s18 }
  0x38   : > { %p4548_p1 = scmp.ne.s32.totalorder %s4742_s18, %s4547_s15  ;;  %p4556_p7 = scmp.lt.s32.totalorder %s4547_s15, %s4547_s15 }
  0x3a   : > { %p4550_p2 = pnand %p4548_p1, %p4508_p0  ;;  %p4557_p8 = por %p4556_p7, %p4555_p4 }
  0x3c   : > { %p4551_p3 = pneg %p4550_p2 }
  0x3e   : > { %p4558_p11 = pnand %p4557_p8, %p4551_p3 }
  0x40   : > { %4561 = shalt.err (!%p4558_p11)
}
  0x41   : > { %4106 = dma.hbm_to_vmem [thread:$0]  (!%p4738_p12), %s6137_s5, 6144, %s4742_s18, [#allocation6], %s4636_s14, %s4636_s14, %s4637_s17  }
  0x42   : > { %p6157_p13 = scmp.ne.s32.totalorder %s6155_s13, 0 }
  0x44   : > { %268 = sbr.rel (%p6157_p13) target bundleno = 1067 (0x42b), region = 48 }
  0x4b   : > { %p6158_p5 = scmp.eq.s32.totalorder %s4702_s28, 0 }
  0x4d   : > { %4607 = dma.done.wait (%p6158_p5), [#allocation3], 1024   ;;  %p6159_p0 = pmov %p6158_p5 }
  0x4f   : > { %4609 = vsyncadd (%p6159_p0), [#allocation3], 4294966272  ;;  %p6160_p6 = pmov %p6159_p0 }
  0x50   : > { %p6161_p9 = pmov %p6159_p0 }
  0x51   : > { %4611 = dma.done.wait (%p6160_p6), [#allocation6], 6144  }
  0x52   : > { %4613 = vsyncadd (%p6161_p9), [#allocation6], 4294961152  ;;  %s3474_s16 = sshll.u32 %s4702_s28, 3  ;;  %v6143_v0 = vmov 0.0   ;;  %vm4639_vm0 = vmmov 0   ;;  %v4154_v1 = vld [vmem:[#allocation2] sm:$0xff]  }
  0x53   : > { %3992 = vmatprep.subr.bf16.mxu0 %v6143_v0  ;;  %4012 = vmatprep.subr.bf16.mxu1 %v6143_v0  ;;  %p306_p12 = scmp.lt.s32.totalorder %s3474_s16, 15  ;;  %v4155_v2 = vld [vmem:[#allocation2 + $0x8] sm:$0xff]   ;;  %v4156_v3 = vld [vmem:[#allocation2 + $0x10] sm:$0xff]   ;;  %v4157_v4 = vld [vmem:[#allocation2 + $0x18] sm:$0xff]   ;;  %vm537_vm1 = vcmask 1042432   ;;  %vm618_vm2 = vcmask 1041408  }
  0x54   : > { %4008 = vmatprep.mubr.msk.bf16.mxu0 %vm4639_vm0, %v6143_v0  ;;  %4028 = vmatprep.mubr.msk.bf16.mxu1 %vm4639_vm0, %v6143_v0  ;;  %v4158_v41 = vld [vmem:[#allocation2 + $0x20] sm:$0xff]   ;;  %v4160_v55 = vld [vmem:[#allocation2 + $0x30] sm:$0xff]   ;;  %vm803_vm3 = vcmask 1041409   ;;  %vm805_vm4 = vcmask 1042434   ;;  %vm807_vm5 = vcmask 1043459   ;;  %vm809_vm6 = vcmask 1044484  }
  0x55   : > { %s6204_s16 = smov (!%p306_p12, %s3474_s16), 15  ;;  %3993 = vmatpush3.bf16.msra.mxu0 %v4154_v1  ;;  %4013 = vmatpush3.bf16.msra.mxu1 %v4154_v1  ;;  %vm811_vm7 = vcmask 1045509   ;;  %vm813_vm8 = vcmask 1046534   ;;  %vm815_vm9 = vcmask 1047559   ;;  %s302_s20 = sand.u32 1, %s4624_s25  }
  0x56   : > { %s3730_s13 = sshll.u32 %s6204_s16, 5  ;;  %3994 = vmatprep.subr.bf16.mxu0 %v6143_v0  ;;  %4014 = vmatprep.subr.bf16.mxu1 %v6143_v0  ;;  %s3473_s21 = sshll.u32 %s302_s20, 3 }
  0x57   : > { %s4813_s17 = scalar_lea.vmem %s6132_s0, %s3730_s13  ;;  %s3727_s22 = sshll.u32 %s4702_s28, 7 }
  0x58   : > { %v4818_v5 = vld [vmem:[%s4813_s17] sm:$0xff]   ;;  %v4821_v6 = vld [vmem:[%s4813_s17 + $0x8] sm:$0xff]   ;;  %v4824_v7 = vld [vmem:[%s4813_s17 + $0x10] sm:$0xff]   ;;  %s304_s23 = scalar_lea.vmem [#allocation7], %s3473_s21  ;;  %s6090_s15 = scalar_lea.hbm %s6139_s7, %s3727_s22 }
  0x59   : > { %3995 = vmatpush3.bf16.msra.mxu0 %v4155_v2  ;;  %4015 = vmatpush3.bf16.msra.mxu1 %v4155_v2  ;;  %v3733_v8 = vunpack.c.l.bf16 %v4818_v5  ;;  %v3734_v9 = vunpack.c.h.bf16 %v4818_v5  ;;  %v3737_v10 = vunpack.c.l.bf16 %v4821_v6  ;;  %v3738_v11 = vunpack.c.h.bf16 %v4821_v6  ;;  %v4831_v12 = vld [vmem:[%s4813_s17 + $0x20] sm:$0xff]   ;;  %v4834_v13 = vld [vmem:[%s4813_s17 + $0x28] sm:$0xff]   ;;  %v4837_v14 = vld [vmem:[%s4813_s17 + $0x30] sm:$0xff]   ;;  %s3384_s29 = sshll.u32 %s304_s23, 4  ;;  %s3371_s10 = scalar_lea.sflag [#allocation4], %s302_s20  ;;  %s6092_s29 = int_to_ptr.vmem [resolvable:$true] %s3384_s29 }
  0x5a   : > { %3996 = vmatprep.subr.bf16.mxu0 %v6143_v0  ;;  %4016 = vmatprep.subr.bf16.mxu1 %v6143_v0  ;;  %v3741_v15 = vunpack.c.l.bf16 %v4824_v7  ;;  %v3742_v16 = vunpack.c.h.bf16 %v4824_v7  ;;  %v3749_v17 = vunpack.c.l.bf16 %v4831_v12  ;;  %v3750_v18 = vunpack.c.h.bf16 %v4831_v12  ;;  %v4844_v19 = vld [vmem:[%s4813_s17 + $0x40] sm:$0xff]   ;;  %v4847_v20 = vld [vmem:[%s4813_s17 + $0x48] sm:$0xff]   ;;  %v4850_v21 = vld [vmem:[%s4813_s17 + $0x50] sm:$0xff]   ;;  %s4562_s19 = scalar_lea.vmem %s6092_s29, 128  ;;  %p6196_p1 = scmp.ne.s32.totalorder %s6153_s11, 0 }
  0x5b   : > { %v3753_v22 = vunpack.c.l.bf16 %v4834_v13  ;;  %v3754_v23 = vunpack.c.h.bf16 %v4834_v13  ;;  %v3757_v24 = vunpack.c.l.bf16 %v4837_v14  ;;  %v3758_v25 = vunpack.c.h.bf16 %v4837_v14  ;;  %v4859_v26 = vld [vmem:[%s4813_s17 + $0x60] sm:$0xff]   ;;  %v4862_v27 = vld [vmem:[%s4813_s17 + $0x68] sm:$0xff]   ;;  %v4865_v28 = vld [vmem:[%s4813_s17 + $0x70] sm:$0xff]   ;;  %p4563_p10 = scmp.ne.s32.totalorder %s6092_s29, %s4562_s19  ;;  %s4640_s28 = smov [#allocation7]  }
  0x5c   : > { %v3765_v29 = vunpack.c.l.bf16 %v4844_v19  ;;  %v3766_v30 = vunpack.c.h.bf16 %v4844_v19  ;;  %v3769_v31 = vunpack.c.l.bf16 %v4847_v20  ;;  %v3770_v32 = vunpack.c.h.bf16 %v4847_v20  ;;  %v4872_v33 = vld [vmem:[%s4813_s17 + $0x80] sm:$0xff]   ;;  %v4875_v34 = vld [vmem:[%s4813_s17 + $0x88] sm:$0xff]   ;;  %v4882_v39 = vld [vmem:[%s4813_s17 + $0x90] sm:$0xff]   ;;  %s4566_s16 = sshll.u32 %s4640_s28, 4  ;;  %s4567_s16 = int_to_ptr.vmem [resolvable:$false] %s4566_s16 }
  0x5d   : > { %3997 = vmatpush3.bf16.msra.mxu0 %v4156_v3  ;;  %4017 = vmatpush3.bf16.msra.mxu1 %v4156_v3  ;;  %v3773_v35 = vunpack.c.l.bf16 %v4850_v21  ;;  %v3774_v36 = vunpack.c.h.bf16 %v4850_v21  ;;  %v3781_v37 = vunpack.c.l.bf16 %v4859_v26  ;;  %v3782_v38 = vunpack.c.h.bf16 %v4859_v26  ;;  %v4885_v40 = vld [vmem:[%s4813_s17 + $0xa0] sm:$0xff]   ;;  %v4892_v46 = vld [vmem:[%s4813_s17 + $0xa8] sm:$0xff]   ;;  %v4895_v47 = vld [vmem:[%s4813_s17 + $0xb0] sm:$0xff]   ;;  %p4564_p2 = pnand %p4563_p10, %p6196_p1  ;;  %s4568_s13 = scalar_lea.vmem %s4567_s16, 256 }
  0x5e   : > { %3998 = vmatprep.subr.bf16.mxu0 %v6143_v0  ;;  %4018 = vmatprep.subr.bf16.mxu1 %v6143_v0  ;;  %v3785_v42 = vunpack.c.l.bf16 %v4862_v27  ;;  %v3786_v43 = vunpack.c.h.bf16 %v4862_v27  ;;  %v3789_v44 = vunpack.c.l.bf16 %v4865_v28  ;;  %v3790_v45 = vunpack.c.h.bf16 %v4865_v28  ;;  %v4904_v52 = vld [vmem:[%s4813_s17 + $0xc0] sm:$0xff]   ;;  %v4907_v53 = vld [vmem:[%s4813_s17 + $0xc8] sm:$0xff]   ;;  %v4914_v58 = vld [vmem:[%s4813_s17 + $0xd0] sm:$0xff]   ;;  %p4569_p4 = scmp.lt.s32.totalorder %s6092_s29, %s4567_s16  ;;  %p4570_p7 = scmp.lt.s32.totalorder %s4568_s13, %s4562_s19 }
  0x5f   : > { %v3797_v48 = vunpack.c.l.bf16 %v4872_v33  ;;  %v4917_v59 = vld [vmem:[%s4813_s17 + $0xe0] sm:$0xff]   ;;  %v4924_v1 = vld [vmem:[%s4813_s17 + $0xe8] sm:$0xff]   ;;  %v4927_v2 = vld [vmem:[%s4813_s17 + $0xf0] sm:$0xff]   ;;  %v3830_v57 = vunpack.c.h.bf16 %v4904_v52  ;;  %v3833_v56 = vunpack.c.l.bf16 %v4907_v53  ;;  %v3834_v60 = vunpack.c.h.bf16 %v4907_v53  ;;  %p4565_p3 = pneg %p4564_p2 }
  0x60   : > { %v4159_v3 = vld [vmem:[#allocation2 + $0x28] sm:$0xff]   ;;  %v3837_v63 = vunpack.c.l.bf16 %v4914_v58  ;;  %v3838_v62 = vunpack.c.h.bf16 %v4914_v58  ;;  %v3845_v61 = vunpack.c.l.bf16 %v4917_v59  ;;  %v3849_v54 = vunpack.c.l.bf16 %v4924_v1  ;;  %v4161_v12 = vld [vmem:[#allocation2 + $0x38] sm:$0xff]   ;;  %p4571_p8 = por %p4570_p7, %p4569_p4 }
  0x61   : > { %3999 = vmatpush3.bf16.msra.mxu0 %v4157_v4  ;;  %4019 = vmatpush3.bf16.msra.mxu1 %v4157_v4  ;;  %v3829_v4 = vunpack.c.l.bf16 %v4904_v52  ;;  %v3850_v52 = vunpack.c.h.bf16 %v4924_v1  ;;  %v3853_v51 = vunpack.c.l.bf16 %v4927_v2  ;;  %v3854_v53 = vunpack.c.h.bf16 %v4927_v2 }
  0x62   : > { %4000 = vmatprep.subr.bf16.mxu0 %v6143_v0  ;;  %4020 = vmatprep.subr.bf16.mxu1 %v6143_v0  ;;  %v441_v50 = vmax.f32 %v3733_v8, 0.0  ;;  %v442_v49 = vmax.f32 %v3734_v9, 0.0  ;;  %v4949_v58 = vmax.f32 %v3737_v10, 0.0  ;;  %v4957_v1 = vmax.f32 %v3741_v15, 0.0  ;;  %p4572_p11 = pnand %p4571_p8, %p4565_p3 }
  0x63   : > { %v4961_v8 = vmax.f32 %v3742_v16, 0.0  ;;  %v449_v5 = vmax.f32 %v3749_v17, 0.0  ;;  %v450_v9 = vmax.f32 %v3750_v18, 0.0  ;;  %v451_v6 = vmax.f32 %v3753_v22, 0.0 }
  0x64   : > { %v4973_v10 = vmax.f32 %v3754_v23, 0.0  ;;  %v4977_v7 = vmax.f32 %v3757_v24, 0.0  ;;  %v457_v15 = vmax.f32 %v3765_v29, 0.0  ;;  %v458_v16 = vmax.f32 %v3766_v30, 0.0 }
  0x65   : > { %4001 = vmatpush3.bf16.msra.mxu0 %v4158_v41  ;;  %4021 = vmatpush3.bf16.msra.mxu1 %v4158_v41  ;;  %v3846_v41 = vunpack.c.h.bf16 %v4917_v59  ;;  %v4953_v59 = vmax.f32 %v3738_v11, 0.0  ;;  %v4981_v11 = vmax.f32 %v3758_v25, 0.0  ;;  %v459_v13 = vmax.f32 %v3769_v31, 0.0 }
  0x66   : > { %4002 = vmatprep.subr.bf16.mxu0 %v6143_v0  ;;  %4022 = vmatprep.subr.bf16.mxu1 %v6143_v0  ;;  %v4991_v17 = vmax.f32 %v3770_v32, 0.0  ;;  %v4995_v18 = vmax.f32 %v3773_v35, 0.0  ;;  %v4999_v14 = vmax.f32 %v3774_v36, 0.0  ;;  %v465_v22 = vmax.f32 %v3781_v37, 0.0 }
  0x67   : > { %v466_v19 = vmax.f32 %v3782_v38, 0.0  ;;  %v467_v20 = vmax.f32 %v3785_v42, 0.0  ;;  %v5009_v23 = vmax.f32 %v3786_v43, 0.0  ;;  %v5013_v21 = vmax.f32 %v3789_v44, 0.0 }
  0x68   : > { %v5017_v24 = vmax.f32 %v3790_v45, 0.0  ;;  %v473_v25 = vmax.f32 %v3797_v48, 0.0  ;;  %v6162_v26 = vunpack.c.h.bf16 %v4872_v33  ;;  %v6163_v29 = vunpack.c.l.bf16 %v4875_v34 }
  0x69   : > { %4003 = vmatpush3.bf16.msra.mxu0 %v4159_v3  ;;  %4023 = vmatpush3.bf16.msra.mxu1 %v4159_v3  ;;  %v6164_v31 = vunpack.c.h.bf16 %v4875_v34  ;;  %v6165_v28 = vunpack.c.l.bf16 %v4882_v39  ;;  %v6166_v36 = vunpack.c.h.bf16 %v4882_v39  ;;  %v6168_v38 = vunpack.c.l.bf16 %v4885_v40 }
  0x6a   : > { %4004 = vmatprep.subr.bf16.mxu0 %v6143_v0  ;;  %4024 = vmatprep.subr.bf16.mxu1 %v6143_v0  ;;  %v474_v27 = vmax.f32 %v6162_v26, 0.0  ;;  %v475_v30 = vmax.f32 %v6163_v29, 0.0  ;;  %v6169_v33 = vunpack.c.h.bf16 %v4885_v40  ;;  %v6170_v44 = vunpack.c.l.bf16 %v4892_v46 }
  0x6b   : > { %v5029_v32 = vmax.f32 %v6164_v31, 0.0  ;;  %v5033_v35 = vmax.f32 %v6165_v28, 0.0  ;;  %v5037_v37 = vmax.f32 %v6166_v36, 0.0  ;;  %v481_v42 = vmax.f32 %v6168_v38, 0.0 }
  0x6c   : > { %v482_v43 = vmax.f32 %v6169_v33, 0.0  ;;  %v483_v45 = vmax.f32 %v6170_v44, 0.0  ;;  %v6171_v34 = vunpack.c.h.bf16 %v4892_v46  ;;  %v6173_v39 = vunpack.c.h.bf16 %v4895_v47 }
  0x6d   : > { %4005 = vmatpush3.bf16.msra.mxu0 %v4160_v55  ;;  %4025 = vmatpush3.bf16.msra.mxu1 %v4160_v55  ;;  %6167 = vst [vmem:[#allocation12_spill] sm:$0xff] %v5037_v37  ;;  %v6172_v55 = vunpack.c.l.bf16 %v4895_v47  ;;  %v489_v26 = vmax.f32 %v3829_v4, 0.0  ;;  %v490_v40 = vmax.f32 %v3830_v57, 0.0  ;;  %v491_v29 = vmax.f32 %v3833_v56, 0.0 }
  0x6e   : > { %4006 = vmatprep.subr.bf16.mxu0 %v6143_v0  ;;  %4026 = vmatprep.subr.bf16.mxu1 %v6143_v0  ;;  %v5047_v48 = vmax.f32 %v6171_v34, 0.0  ;;  %v5055_v3 = vmax.f32 %v6173_v39, 0.0  ;;  %v5057_v31 = vmax.f32 %v3834_v60, 0.0  ;;  %v5059_v28 = vmax.f32 %v3837_v63, 0.0 }
  0x6f   : > { %v5051_v2 = vmax.f32 %v6172_v55, 0.0  ;;  %v5061_v46 = vmax.f32 %v3838_v62, 0.0  ;;  %v497_v36 = vmax.f32 %v3845_v61, 0.0  ;;  %v498_v38 = vmax.f32 %v3846_v41, 0.0 }
  0x70   : > { %6174 = vst [vmem:[#allocation13_spill] sm:$0xff] %v5055_v3  ;;  %v499_v47 = vmax.f32 %v3849_v54, 0.0  ;;  %v5065_v33 = vmax.f32 %v3850_v52, 0.0  ;;  %v5069_v57 = vmax.f32 %v3854_v53, 0.0  ;;  %v505_v56 = vadd.f32 %v442_v49, %v441_v50 }
  0x71   : > { %4007 = vmatpush3.bf16.msra.mxu0 %v4161_v12  ;;  %4027 = vmatpush3.bf16.msra.mxu1 %v4161_v12  ;;  %6175 = vst [vmem:[#allocation14_spill] sm:$0xff] %v5061_v46  ;;  %v5067_v12 = vmax.f32 %v3853_v51, 0.0  ;;  %v509_v60 = vadd.f32 %v450_v9, %v449_v5  ;;  %v513_v4 = vadd.f32 %v458_v16, %v457_v15 }
  0x72   : > { %4052 = vmatprep.subr.bf16.mxu1 %v6143_v0  ;;  %4032 = vmatprep.subr.bf16.mxu0 %v6143_v0  ;;  %6176 = vst [vmem:[#allocation15_spill] sm:$0xff] %v5069_v57  ;;  %v517_v63 = vadd.f32 %v466_v19, %v465_v22  ;;  %v521_v44 = vadd.f32 %v474_v27, %v473_v25 }
  0x73   : > { %v525_v62 = vadd.f32 %v482_v43, %v481_v42  ;;  %v529_v34 = vadd.f32 %v490_v40, %v489_v26  ;;  %v533_v61 = vadd.f32 %v498_v38, %v497_v36  ;;  %v506_v41 = vadd.f32 %v505_v56, %v4949_v58 }
  0x74   : > { %v510_v55 = vadd.f32 %v509_v60, %v451_v6  ;;  %v514_v39 = vadd.f32 %v513_v4, %v459_v13  ;;  %v518_v0 = vadd.f32 %v517_v63, %v467_v20  ;;  %v522_v54 = vadd.f32 %v521_v44, %v475_v30 }
  0x75   : > { %v526_v52 = vadd.f32 %v525_v62, %v483_v45  ;;  %v530_v46 = vadd.f32 %v529_v34, %v491_v29  ;;  %v534_v51 = vadd.f32 %v533_v61, %v499_v47  ;;  %v507_v53 = vadd.f32 %v506_v41, %v4953_v59 }
  0x76   : > { %v511_v49 = vadd.f32 %v510_v55, %v4973_v10  ;;  %v515_v50 = vadd.f32 %v514_v39, %v4991_v17  ;;  %v519_v5 = vadd.f32 %v518_v0, %v5009_v23  ;;  %v523_v9 = vadd.f32 %v522_v54, %v5029_v32 }
  0x77   : > { %v527_v15 = vadd.f32 %v526_v52, %v5047_v48  ;;  %v531_v58 = vadd.f32 %v530_v46, %v5057_v31  ;;  %v535_v6 = vadd.f32 %v534_v51, %v5065_v33  ;;  %v5081_v16 = vadd.f32 %v507_v53, %v4957_v1 }
  0x78   : > { %v5084_v13 = vadd.f32 %v511_v49, %v4977_v7  ;;  %v5087_v22 = vadd.f32 %v515_v50, %v4995_v18  ;;  %v5090_v19 = vadd.f32 %v519_v5, %v5013_v21  ;;  %v5093_v0 = vadd.f32 %v523_v9, %v5033_v35 }
  0x79   : > { %v5096_v20 = vadd.f32 %v527_v15, %v5051_v2  ;;  %v5099_v25 = vadd.f32 %v531_v58, %v5059_v28  ;;  %v5102_v27 = vadd.f32 %v535_v6, %v5067_v12  ;;  %v538_v30 = vsel %vm537_vm1, %v5081_v16, 0.0 }
  0x7a   : > { %6177 = vst [vmem:[#allocation16_spill] sm:$0xff] %v5084_v13  ;;  %6178 = vst [vmem:[#allocation17_spill] sm:$0xff] %v5087_v22  ;;  %v545_v42 = vsel %vm537_vm1, %v5084_v13, 0.0  ;;  %v552_v43 = vsel %vm537_vm1, %v5087_v22, 0.0  ;;  %v559_v45 = vsel %vm537_vm1, %v5090_v19, 0.0  ;;  %v539_v26 = vrot.slane %v538_v30, 4 }
  0x7b   : > { %6179 = vst [vmem:[#allocation18_spill] sm:$0xff] %v5090_v19  ;;  %6180 = vst [vmem:[#allocation19_spill] sm:$0xff] %v5093_v0  ;;  %v546_v40 = vrot.slane %v545_v42, 4  ;;  %v553_v29 = vrot.slane %v552_v43, 4  ;;  %v560_v46 = vrot.slane %v559_v45, 4  ;;  %v566_v36 = vsel %vm537_vm1, %v5093_v0, 0.0 }
  0x7c   : > { %6181 = vst [vmem:[#allocation20_spill] sm:$0xff] %v5096_v20  ;;  %6182 = vst [vmem:[#allocation21_spill] sm:$0xff] %v5099_v25  ;;  %v573_v38 = vsel %vm537_vm1, %v5096_v20, 0.0  ;;  %v580_v47 = vsel %vm537_vm1, %v5099_v25, 0.0  ;;  %v587_v56 = vsel %vm537_vm1, %v5102_v27, 0.0  ;;  %v540_v60 = vadd.f32 %v539_v26, %v538_v30 }
  0x7d   : > { %6183 = vst [vmem:[#allocation22_spill] sm:$0xff] %v5102_v27  ;;  %v547_v4 = vadd.f32 %v546_v40, %v545_v42  ;;  %v554_v63 = vadd.f32 %v553_v29, %v552_v43  ;;  %v561_v44 = vadd.f32 %v560_v46, %v559_v45  ;;  %v567_v62 = vrot.slane %v566_v36, 4 }
  0x7e   : > { %v574_v34 = vrot.slane %v573_v38, 4  ;;  %v581_v61 = vrot.slane %v580_v47, 4  ;;  %v588_v41 = vrot.slane %v587_v56, 4  ;;  %v541_v55 = vrot.slane %v540_v60, 2 }
  0x7f   : > { %v548_v39 = vrot.slane %v547_v4, 2  ;;  %v555_v54 = vrot.slane %v554_v63, 2  ;;  %v562_v52 = vrot.slane %v561_v44, 2  ;;  %v568_v51 = vadd.f32 %v567_v62, %v566_v36 }
  0x80   : > { %v575_v53 = vadd.f32 %v574_v34, %v573_v38  ;;  %v582_v49 = vadd.f32 %v581_v61, %v580_v47  ;;  %v589_v50 = vadd.f32 %v588_v41, %v587_v56  ;;  %v542_v5 = vadd.f32 %v541_v55, %v540_v60 }
  0x81   : > { %v549_v9 = vadd.f32 %v548_v39, %v547_v4  ;;  %v556_v15 = vadd.f32 %v555_v54, %v554_v63  ;;  %v563_v58 = vadd.f32 %v562_v52, %v561_v44  ;;  %v569_v6 = vrot.slane %v568_v51, 2 }
  0x82   : > { %v576_v30 = vrot.slane %v575_v53, 2  ;;  %v583_v42 = vrot.slane %v582_v49, 2  ;;  %v590_v43 = vrot.slane %v589_v50, 2  ;;  %v543_v45 = vrot.slane %v542_v5, 1 }
  0x83   : > { %v550_v26 = vrot.slane %v549_v9, 1  ;;  %v557_v40 = vrot.slane %v556_v15, 1  ;;  %v564_v29 = vrot.slane %v563_v58, 1  ;;  %v570_v46 = vadd.f32 %v569_v6, %v568_v51 }
  0x84   : > { %v577_v57 = vadd.f32 %v576_v30, %v575_v53  ;;  %v584_v3 = vadd.f32 %v583_v42, %v582_v49  ;;  %v591_v37 = vadd.f32 %v590_v43, %v589_v50  ;;  %v5120_v36 = vadd.f32 %v543_v45, %v542_v5 }
  0x85   : > { %v5122_v38 = vadd.f32 %v550_v26, %v549_v9  ;;  %v5124_v47 = vadd.f32 %v557_v40, %v556_v15  ;;  %v5126_v56 = vadd.f32 %v564_v29, %v563_v58  ;;  %v571_v60 = vrot.slane %v570_v46, 1 }
  0x86   : > { %v578_v4 = vrot.slane %v577_v57, 1  ;;  %v585_v63 = vrot.slane %v584_v3, 1  ;;  %v592_v44 = vrot.slane %v591_v37, 1  ;;  %v602_v62 = vrot.slane %v5081_v16, 3 }
  0x87   : > { %v603_v34 = vrot.slane %v5084_v13, 3  ;;  %v604_v61 = vrot.slane %v5087_v22, 3  ;;  %v605_v41 = vrot.slane %v5090_v19, 3  ;;  %v5132_v55 = vadd.f32 %v571_v60, %v570_v46 }
  0x88   : > { %v5134_v39 = vadd.f32 %v578_v4, %v577_v57  ;;  %v5136_v54 = vadd.f32 %v585_v63, %v584_v3  ;;  %v5138_v52 = vadd.f32 %v592_v44, %v591_v37  ;;  %v606_v51 = vrot.slane %v5093_v0, 3 }
  0x89   : > { %v607_v53 = vrot.slane %v5096_v20, 3  ;;  %v608_v49 = vrot.slane %v5099_v25, 3  ;;  %v609_v50 = vrot.slane %v5102_v27, 3  ;;  %v619_v5 = vsel %vm618_vm2, %v602_v62, 0.0 }
  0x8a   : > { %v626_v9 = vsel %vm618_vm2, %v603_v34, 0.0  ;;  %v633_v15 = vsel %vm618_vm2, %v604_v61, 0.0  ;;  %v640_v57 = vsel %vm618_vm2, %v605_v41, 0.0  ;;  %v620_v3 = vrot.slane %v619_v5, 4 }
  0x8b   : > { %v627_v58 = vrot.slane %v626_v9, 4  ;;  %v634_v37 = vrot.slane %v633_v15, 4  ;;  %v641_v6 = vrot.slane %v640_v57, 4  ;;  %v647_v30 = vsel %vm618_vm2, %v606_v51, 0.0 }
  0x8c   : > { %v654_v42 = vsel %vm618_vm2, %v607_v53, 0.0  ;;  %v661_v43 = vsel %vm618_vm2, %v608_v49, 0.0  ;;  %v668_v45 = vsel %vm618_vm2, %v609_v50, 0.0  ;;  %v621_v26 = vadd.f32 %v620_v3, %v619_v5 }
  0x8d   : > { %v628_v40 = vadd.f32 %v627_v58, %v626_v9  ;;  %v635_v29 = vadd.f32 %v634_v37, %v633_v15  ;;  %v642_v46 = vadd.f32 %v641_v6, %v640_v57  ;;  %v648_v60 = vrot.slane %v647_v30, 4 }
  0x8e   : > { %v655_v4 = vrot.slane %v654_v42, 4  ;;  %v662_v63 = vrot.slane %v661_v43, 4  ;;  %v669_v44 = vrot.slane %v668_v45, 4  ;;  %v622_v62 = vrot.slane %v621_v26, 2 }
  0x8f   : > { %v629_v34 = vrot.slane %v628_v40, 2  ;;  %v636_v61 = vrot.slane %v635_v29, 2  ;;  %v643_v41 = vrot.slane %v642_v46, 2  ;;  %v649_v27 = vadd.f32 %v648_v60, %v647_v30 }
  0x90   : > { %v656_v51 = vadd.f32 %v655_v4, %v654_v42  ;;  %v663_v25 = vadd.f32 %v662_v63, %v661_v43  ;;  %v670_v53 = vadd.f32 %v669_v44, %v668_v45  ;;  %v623_v20 = vadd.f32 %v622_v62, %v621_v26 }
  0x91   : > { %v630_v49 = vadd.f32 %v629_v34, %v628_v40  ;;  %v637_v0 = vadd.f32 %v636_v61, %v635_v29  ;;  %v644_v50 = vadd.f32 %v643_v41, %v642_v46  ;;  %v650_v5 = vrot.slane %v649_v27, 2 }
  0x92   : > { %v657_v9 = vrot.slane %v656_v51, 2  ;;  %v664_v15 = vrot.slane %v663_v25, 2  ;;  %v671_v57 = vrot.slane %v670_v53, 2  ;;  %v624_v3 = vrot.slane %v623_v20, 1 }
  0x93   : > { %v631_v58 = vrot.slane %v630_v49, 1  ;;  %v638_v37 = vrot.slane %v637_v0, 1  ;;  %v645_v6 = vrot.slane %v644_v50, 1  ;;  %v651_v19 = vadd.f32 %v650_v5, %v649_v27 }
  0x94   : > { %v658_v22 = vadd.f32 %v657_v9, %v656_v51  ;;  %v665_v13 = vadd.f32 %v664_v15, %v663_v25  ;;  %v672_v30 = vadd.f32 %v671_v57, %v670_v53  ;;  %v5152_v42 = vadd.f32 %v624_v3, %v623_v20 }
  0x95   : > { %v5154_v43 = vadd.f32 %v631_v58, %v630_v49  ;;  %v5156_v45 = vadd.f32 %v638_v37, %v637_v0  ;;  %v5158_v26 = vadd.f32 %v645_v6, %v644_v50  ;;  %v652_v40 = vrot.slane %v651_v19, 1 }
  0x96   : > { %v659_v29 = vrot.slane %v658_v22, 1  ;;  %v666_v46 = vrot.slane %v665_v13, 1  ;;  %v673_v60 = vrot.slane %v672_v30, 1  ;;  %v747_v27 = vadd.f32 %v5152_v42, %v5120_v36 }
  0x97   : > { %v748_v25 = vadd.f32 %v5154_v43, %v5122_v38  ;;  %v749_v20 = vadd.f32 %v5156_v45, %v5124_v47  ;;  %v750_v0 = vadd.f32 %v5158_v26, %v5126_v56  ;;  %v5168_v4 = vadd.f32 %v652_v40, %v651_v19 }
  0x98   : > { %v5170_v63 = vadd.f32 %v659_v29, %v658_v22  ;;  %v5172_v44 = vadd.f32 %v666_v46, %v665_v13  ;;  %v5174_v62 = vadd.f32 %v673_v60, %v672_v30  ;;  %v763_v36 = vpack.c.bf16 %v747_v27, %v747_v27  ;;  %v6186_v29 = vld [vmem:[#allocation14_spill] sm:$0xff] }
  0x99   : > { %v764_v34 = vpack.c.bf16 %v748_v25, %v748_v25  ;;  %v765_v61 = vpack.c.bf16 %v749_v20, %v749_v20  ;;  %v766_v38 = vpack.c.bf16 %v750_v0, %v750_v0  ;;  %v751_v47 = vadd.f32 %v5168_v4, %v5132_v55  ;;  %v6190_v27 = vld [vmem:[#allocation18_spill] sm:$0xff]  ;;  %v6191_v20 = vld [vmem:[#allocation19_spill] sm:$0xff] }
  0x9a   : > { %v752_v56 = vadd.f32 %v5170_v63, %v5134_v39  ;;  %v753_v22 = vadd.f32 %v5172_v44, %v5136_v54  ;;  %v754_v13 = vadd.f32 %v5174_v62, %v5138_v52  ;;  %v795_v19 = vunpack.c.l.b16 %v763_v36 }
  0x9b   : > { %v796_v41 = vunpack.c.l.b16 %v764_v34  ;;  %v797_v51 = vunpack.c.l.b16 %v765_v61  ;;  %v798_v53 = vunpack.c.l.b16 %v766_v38  ;;  %v767_v49 = vpack.c.bf16 %v751_v47, %v751_v47  ;;  %v6192_v34 = vld [vmem:[#allocation20_spill] sm:$0xff]  ;;  %v6193_v38 = vld [vmem:[#allocation21_spill] sm:$0xff] }
  0x9c   : > { %v768_v50 = vpack.c.bf16 %v752_v56, %v752_v56  ;;  %v769_v5 = vpack.c.bf16 %v753_v22, %v753_v22  ;;  %v770_v9 = vpack.c.bf16 %v754_v13, %v754_v13  ;;  %v980_v55 = vadd.f32 %v4957_v1, %v4953_v59  ;;  %v6194_v56 = vld [vmem:[#allocation22_spill] sm:$0xff] }
  0x9d   : > { %v804_v15 = vsel %vm803_vm3, %v796_v41, %v795_v19  ;;  %v984_v39 = vadd.f32 %v4977_v7, %v4973_v10  ;;  %v988_v54 = vadd.f32 %v4995_v18, %v4991_v17  ;;  %v799_v52 = vunpack.c.l.b16 %v767_v49 }
  0x9e   : > { %v800_v57 = vunpack.c.l.b16 %v768_v50  ;;  %v801_v3 = vunpack.c.l.b16 %v769_v5  ;;  %v802_v58 = vunpack.c.l.b16 %v770_v9  ;;  %v806_v37 = vsel %vm805_vm4, %v797_v51, %v804_v15 }
  0x9f   : > { %v5193_v6 = vadd.f32 %v980_v55, %v4961_v8  ;;  %v5196_v30 = vadd.f32 %v984_v39, %v4981_v11  ;;  %v5199_v59 = vadd.f32 %v988_v54, %v4999_v14  ;;  %v808_v1 = vsel %vm807_vm5, %v798_v53, %v806_v37  ;;  %v5247_v54 = vld [vmem:[#allocation2] sm:$0xff]  }
  0xa0   : > { %v992_v10 = vadd.f32 %v5013_v21, %v5009_v23  ;;  %v996_v7 = vadd.f32 %v5033_v35, %v5029_v32  ;;  %v1000_v17 = vadd.f32 %v5051_v2, %v5047_v48  ;;  %v810_v8 = vsel %vm809_vm6, %v799_v52, %v808_v1  ;;  %v6184_v21 = vld [vmem:[#allocation12_spill] sm:$0xff]  ;;  %v6185_v35 = vld [vmem:[#allocation13_spill] sm:$0xff] }
  0xa1   : > { %v1004_v11 = vadd.f32 %v5059_v28, %v5057_v31  ;;  %v1008_v18 = vadd.f32 %v5067_v12, %v5065_v33  ;;  %v675_v14 = vrot.slane %v5081_v16, 5  ;;  %v812_v40 = vsel %vm811_vm7, %v800_v57, %v810_v8  ;;  %v6187_v28 = vld [vmem:[#allocation15_spill] sm:$0xff]  ;;  %v6188_v12 = vld [vmem:[#allocation16_spill] sm:$0xff] }
  0xa2   : > { %v5216_v23 = vadd.f32 %v992_v10, %v5017_v24  ;;  %v5219_v32 = vadd.f32 %v996_v7, %v6184_v21  ;;  %v5222_v48 = vadd.f32 %v1000_v17, %v6185_v35  ;;  %v814_v2 = vsel %vm813_vm8, %v801_v3, %v812_v40  ;;  %v6189_v24 = vld [vmem:[#allocation17_spill] sm:$0xff] }
  0xa3   : > { %v5226_v31 = vadd.f32 %v1004_v11, %v6186_v29  ;;  %v5229_v33 = vadd.f32 %v1008_v18, %v6187_v28  ;;  %v676_v16 = vrot.slane %v6188_v12, 5  ;;  %v816_v46 = vsel %vm815_vm9, %v802_v58, %v814_v2  ;;  %v5253_v29 = vld [vmem:[#allocation2 + $0x8] sm:$0xff]  }
  0xa4   : > { %v677_v60 = vrot.slane %v6189_v24, 5  ;;  %v678_v25 = vrot.slane %v6190_v27, 5  ;;  %v679_v0 = vrot.slane %v6191_v20, 5  ;;  %v817_v36 = vpack.c.b16 %v816_v46, %v816_v46 }
  0xa5   : > { %v680_v61 = vrot.slane %v6192_v34, 5  ;;  %v681_v47 = vrot.slane %v6193_v38, 5  ;;  %v682_v22 = vrot.slane %v6194_v56, 5  ;;  %v691_v13 = vsel %vm537_vm1, %v675_v14, 0.0 }
  0xa6   : > { %v698_v19 = vsel %vm537_vm1, %v676_v16, 0.0  ;;  %v705_v41 = vsel %vm537_vm1, %v677_v60, 0.0  ;;  %v712_v51 = vsel %vm537_vm1, %v678_v25, 0.0  ;;  %4009 = vmatmul.mubr.bf16.vlgmr.msra.gmra.mrb[0].mxu0 %v817_v36  ;;  %v692_v53 = vrot.slane %v691_v13, 4 }
  0xa7   : > { %v699_v49 = vrot.slane %v698_v19, 4  ;;  %v706_v50 = vrot.slane %v705_v41, 4  ;;  %v713_v5 = vrot.slane %v712_v51, 4  ;;  %v719_v9 = vsel %vm537_vm1, %v679_v0, 0.0  ;;  %4033 = vmatpush3.bf16.msra.mxu0 %v5247_v54 }
  0xa8   : > { %v726_v15 = vsel %vm537_vm1, %v680_v61, 0.0  ;;  %v733_v55 = vsel %vm537_vm1, %v681_v47, 0.0  ;;  %v740_v39 = vsel %vm537_vm1, %v682_v22, 0.0  ;;  %v6195_v52 = vmov 0.0   ;;  %v5257_v22 = vld [vmem:[#allocation2 + $0x10] sm:$0xff]  }
  0xa9   : > { %4048 = vmatprep.mubr.msk.bf16.mxu0 %vm4639_vm0, %v6195_v52  ;;  %v693_v57 = vadd.f32 %v692_v53, %v691_v13  ;;  %v700_v3 = vadd.f32 %v699_v49, %v698_v19  ;;  %v707_v58 = vadd.f32 %v706_v50, %v705_v41  ;;  %v714_v37 = vadd.f32 %v713_v5, %v712_v51 }
  0xaa   : > { %4034 = vmatprep.subr.bf16.mxu0 %v6195_v52  ;;  %v720_v1 = vrot.slane %v719_v9, 4  ;;  %v727_v10 = vrot.slane %v726_v15, 4  ;;  %v734_v7 = vrot.slane %v733_v55, 4  ;;  %v741_v17 = vrot.slane %v740_v39, 4 }
  0xab   : > { %v694_v8 = vrot.slane %v693_v57, 2  ;;  %v701_v11 = vrot.slane %v700_v3, 2  ;;  %v708_v18 = vrot.slane %v707_v58, 2  ;;  %v715_v14 = vrot.slane %v714_v37, 2  ;;  %4035 = vmatpush3.bf16.msra.mxu0 %v5253_v29 }
  0xac   : > { %v721_v40 = vadd.f32 %v720_v1, %v719_v9  ;;  %v728_v21 = vadd.f32 %v727_v10, %v726_v15  ;;  %v735_v35 = vadd.f32 %v734_v7, %v733_v55  ;;  %v742_v2 = vadd.f32 %v741_v17, %v740_v39  ;;  %4036 = vmatprep.subr.bf16.mxu0 %v6195_v52  ;;  %v5265_v1 = vld [vmem:[#allocation2 + $0x18] sm:$0xff]  }
  0xad   : > { %v695_v28 = vadd.f32 %v694_v8, %v693_v57  ;;  %v702_v12 = vadd.f32 %v701_v11, %v700_v3  ;;  %v709_v16 = vadd.f32 %v708_v18, %v707_v58  ;;  %v716_v46 = vadd.f32 %v715_v14, %v714_v37  ;;  %v5269_v10 = vld [vmem:[%s4813_s17 + $0x18] sm:$0xff]  }
  0xae   : > { %v722_v24 = vrot.slane %v721_v40, 2  ;;  %v729_v60 = vrot.slane %v728_v21, 2  ;;  %v736_v27 = vrot.slane %v735_v35, 2  ;;  %v743_v25 = vrot.slane %v742_v2, 2 }
  0xaf   : > { %v696_v20 = vrot.slane %v695_v28, 1  ;;  %v703_v0 = vrot.slane %v702_v12, 1  ;;  %v710_v36 = vrot.slane %v709_v16, 1  ;;  %v717_v34 = vrot.slane %v716_v46, 1  ;;  %4037 = vmatpush3.bf16.msra.mxu0 %v5257_v22 }
  0xb0   : > { %v723_v61 = vadd.f32 %v722_v24, %v721_v40  ;;  %v730_v38 = vadd.f32 %v729_v60, %v728_v21  ;;  %v737_v47 = vadd.f32 %v736_v27, %v735_v35  ;;  %v744_v56 = vadd.f32 %v743_v25, %v742_v2  ;;  %4038 = vmatprep.subr.bf16.mxu0 %v6195_v52  ;;  %v3865_v35 = vld [vmem:[%s4813_s17 + $0x38] sm:$0xff]  }
  0xb1   : > { %v697_v13 = vadd.f32 %v696_v20, %v695_v28  ;;  %v704_v19 = vadd.f32 %v703_v0, %v702_v12  ;;  %v711_v41 = vadd.f32 %v710_v36, %v709_v16  ;;  %v718_v51 = vadd.f32 %v717_v34, %v716_v46  ;;  %v3869_v2 = vld [vmem:[%s4813_s17 + $0x58] sm:$0xff]  }
  0xb2   : > { %v724_v53 = vrot.slane %v723_v61, 1  ;;  %v731_v49 = vrot.slane %v730_v38, 1  ;;  %v738_v50 = vrot.slane %v737_v47, 1  ;;  %v745_v5 = vrot.slane %v744_v56, 1 }
  0xb3   : > { %v755_v9 = vadd.f32 %v697_v13, %v5152_v42  ;;  %v756_v15 = vadd.f32 %v704_v19, %v5154_v43  ;;  %v757_v55 = vadd.f32 %v711_v41, %v5156_v45  ;;  %v758_v39 = vadd.f32 %v718_v51, %v5158_v26  ;;  %4039 = vmatpush3.bf16.msra.mxu0 %v5265_v1  ;;  %v5291_v13 = vld [vmem:[#allocation2 + $0x28] sm:$0xff]  }
  0xb4   : > { %v725_v57 = vadd.f32 %v724_v53, %v723_v61  ;;  %v732_v3 = vadd.f32 %v731_v49, %v730_v38  ;;  %v739_v58 = vadd.f32 %v738_v50, %v737_v47  ;;  %v746_v37 = vadd.f32 %v745_v5, %v744_v56  ;;  %4040 = vmatprep.subr.bf16.mxu0 %v6195_v52  ;;  %v3881_v38 = vld [vmem:[%s4813_s17 + $0xb8] sm:$0xff]  }
  0xb5   : > { %v907_v7 = vpack.c.bf16 %v755_v9, %v755_v9  ;;  %v908_v42 = vpack.c.bf16 %v756_v15, %v756_v15  ;;  %v909_v17 = vpack.c.bf16 %v757_v55, %v757_v55  ;;  %v910_v43 = vpack.c.bf16 %v758_v39, %v758_v39  ;;  %v3885_v47 = vld [vmem:[%s4813_s17 + $0xd8] sm:$0xff]  }
  0xb6   : > { %v759_v45 = vadd.f32 %v725_v57, %v5168_v4  ;;  %v760_v26 = vadd.f32 %v732_v3, %v5170_v63  ;;  %v761_v8 = vadd.f32 %v739_v58, %v5172_v44  ;;  %v762_v11 = vadd.f32 %v746_v37, %v5174_v62  ;;  %v5278_v4 = vld [vmem:[#allocation2 + $0x20] sm:$0xff]   ;;  %v3873_v63 = vld [vmem:[%s4813_s17 + $0x78] sm:$0xff]  }
  0xb7   : > { %v923_v18 = vunpack.c.l.b16 %v907_v7  ;;  %v924_v14 = vunpack.c.l.b16 %v908_v42  ;;  %v925_v40 = vunpack.c.l.b16 %v909_v17  ;;  %v926_v21 = vunpack.c.l.b16 %v910_v43  ;;  %4041 = vmatpush3.bf16.msra.mxu0 %v5278_v4  ;;  %v3877_v44 = vld [vmem:[%s4813_s17 + $0x98] sm:$0xff]   ;;  %v5300_v42 = vld [vmem:[#allocation2 + $0x30] sm:$0xff]  }
  0xb8   : > { %v911_v28 = vpack.c.bf16 %v759_v45, %v759_v45  ;;  %v912_v12 = vpack.c.bf16 %v760_v26, %v760_v26  ;;  %v913_v16 = vpack.c.bf16 %v761_v8, %v761_v8  ;;  %v914_v46 = vpack.c.bf16 %v762_v11, %v762_v11  ;;  %4042 = vmatprep.subr.bf16.mxu0 %v6195_v52  ;;  %v3889_v53 = vld [vmem:[%s4813_s17 + $0xf8] sm:$0xff]  }
  0xb9   : > { %v931_v62 = vsel %vm803_vm3, %v924_v14, %v923_v18  ;;  %v3745_v24 = vunpack.c.l.bf16 %v5269_v10  ;;  %v3746_v25 = vunpack.c.h.bf16 %v5269_v10  ;;  %v3761_v20 = vunpack.c.l.bf16 %v3865_v35  ;;  %v4164_v14 = vld [vmem:[%s6135_s3 + $0x4] ss:$24 sps:$4 sm:$0xff]  }
  0xba   : > { %v927_v60 = vunpack.c.l.b16 %v911_v28  ;;  %v928_v27 = vunpack.c.l.b16 %v912_v12  ;;  %v929_v0 = vunpack.c.l.b16 %v913_v16  ;;  %v930_v36 = vunpack.c.l.b16 %v914_v46 }
  0xbb   : > { %v932_v34 = vsel %vm805_vm4, %v925_v40, %v931_v62  ;;  %v3762_v61 = vunpack.c.h.bf16 %v3865_v35  ;;  %4043 = vmatpush3.bf16.msra.mxu0 %v5291_v13  ;;  %v3777_v19 = vunpack.c.l.bf16 %v3869_v2  ;;  %v3778_v41 = vunpack.c.h.bf16 %v3869_v2 }
  0xbc   : > { %v933_v56 = vsel %vm807_vm5, %v926_v21, %v932_v34  ;;  %v3793_v51 = vunpack.c.l.bf16 %v3873_v63  ;;  %4044 = vmatprep.subr.bf16.mxu0 %v6195_v52  ;;  %v3794_v50 = vunpack.c.h.bf16 %v3873_v63  ;;  %v3809_v5 = vunpack.c.l.bf16 %v3877_v44  ;;  %v5308_v63 = vld [vmem:[#allocation2 + $0x38] sm:$0xff]  }
  0xbd   : > { %v934_v49 = vsel %vm809_vm6, %v927_v60, %v933_v56  ;;  %v3810_v9 = vunpack.c.h.bf16 %v3877_v44  ;;  %v3825_v55 = vunpack.c.l.bf16 %v3881_v38  ;;  %v3826_v39 = vunpack.c.h.bf16 %v3881_v38 }
  0xbe   : > { %v935_v15 = vsel %vm811_vm7, %v928_v27, %v934_v49  ;;  %v3841_v57 = vunpack.c.l.bf16 %v3885_v47  ;;  %v3842_v58 = vunpack.c.h.bf16 %v3885_v47  ;;  %v3857_v37 = vunpack.c.l.bf16 %v3889_v53 }
  0xbf   : > { %v936_v3 = vsel %vm813_vm8, %v929_v0, %v935_v15  ;;  %v3858_v10 = vunpack.c.h.bf16 %v3889_v53  ;;  %4045 = vmatpush3.bf16.msra.mxu0 %v5300_v42  ;;  %v447_v17 = vmax.f32 %v3745_v24, 0.0  ;;  %v455_v43 = vmax.f32 %v3761_v20, 0.0 }
  0xc0   : > { %v937_v7 = vsel %vm815_vm9, %v930_v36, %v936_v3  ;;  %v463_v45 = vmax.f32 %v3777_v19, 0.0  ;;  %4046 = vmatprep.subr.bf16.mxu0 %v6195_v52  ;;  %v448_v8 = vmax.f32 %v3746_v25, 0.0  ;;  %v456_v11 = vmax.f32 %v3762_v61, 0.0 }
  0xc1   : > { %v938_v26 = vpack.c.b16 %v937_v7, %v937_v7  ;;  %v471_v18 = vmax.f32 %v3793_v51, 0.0  ;;  %v464_v40 = vmax.f32 %v3778_v41, 0.0  ;;  %v472_v21 = vmax.f32 %v3794_v50, 0.0 }
  0xc2   : > { %v479_v35 = vmax.f32 %v3809_v5, 0.0  ;;  %v487_v2 = vmax.f32 %v3825_v55, 0.0  ;;  %v480_v28 = vmax.f32 %v3810_v9, 0.0  ;;  %v488_v12 = vmax.f32 %v3826_v39, 0.0 }
  0xc3   : > { %4029 = vmatmul.mubr.bf16.vlgmr.msra.gmra.mrb[0].mxu1 %v938_v26  ;;  %v495_v16 = vmax.f32 %v3841_v57, 0.0  ;;  %v503_v46 = vmax.f32 %v3857_v37, 0.0  ;;  %4047 = vmatpush3.bf16.msra.mxu0 %v5308_v63  ;;  %v496_v44 = vmax.f32 %v3842_v58, 0.0  ;;  %v982_v62 = vadd.f32 %v5193_v6, %v447_v17 }
  0xc4   : > { %4053 = vmatpush3.bf16.msra.mxu1 %v5247_v54  ;;  %v986_v24 = vadd.f32 %v5196_v30, %v455_v43  ;;  %v990_v60 = vadd.f32 %v5199_v59, %v463_v45  ;;  %4068 = vmatprep.mubr.msk.bf16.mxu1 %vm4639_vm0, %v6195_v52  ;;  %v504_v27 = vmax.f32 %v3858_v10, 0.0  ;;  %v994_v25 = vadd.f32 %v5216_v23, %v471_v18 }
  0xc5   : > { %4054 = vmatprep.subr.bf16.mxu1 %v6195_v52  ;;  %v998_v54 = vadd.f32 %v5219_v32, %v479_v35  ;;  %v1002_v20 = vadd.f32 %v5222_v48, %v487_v2  ;;  %v5320_v0 = vadd.f32 %v982_v62, %v448_v8  ;;  %v1006_v30 = vadd.f32 %v5226_v31, %v495_v16 }
  0xc6   : > { %v5322_v36 = vadd.f32 %v986_v24, %v456_v11  ;;  %v5324_v6 = vadd.f32 %v990_v60, %v464_v40  ;;  %2600 = vmatprep.subr.bf16.mxu0 %v4164_v14  ;;  %v5327_v59 = vadd.f32 %v994_v25, %v472_v21  ;;  %v1010_v23 = vadd.f32 %v5229_v33, %v503_v46 }
  0xc7   : > { %v5329_v34 = vadd.f32 %v998_v54, %v480_v28  ;;  %v5331_v61 = vadd.f32 %v1002_v20, %v488_v12  ;;  %v5335_v32 = vadd.f32 %v1006_v30, %v496_v44  ;;  %v1076_v48 = vrot.slane %v5320_v0, 3 }
  0xc8   : > { %4055 = vmatpush3.bf16.msra.mxu1 %v5253_v29  ;;  %v1077_v38 = vrot.slane %v5322_v36, 3  ;;  %v1078_v47 = vrot.slane %v5324_v6, 3  ;;  %v5341_v31 = vadd.f32 %v1010_v23, %v504_v27  ;;  %v1079_v56 = vrot.slane %v5327_v59, 3 }
  0xc9   : > { %4056 = vmatprep.subr.bf16.mxu1 %v6195_v52  ;;  %v1080_v19 = vrot.slane %v5329_v34, 3  ;;  %v1081_v33 = vrot.slane %v5331_v61, 3  ;;  %v1082_v29 = vrot.slane %v5335_v32, 3  ;;  %v1092_v41 = vsel %vm618_vm2, %v1076_v48, 0.0 }
  0xca   : > { %v1099_v51 = vsel %vm618_vm2, %v1077_v38, 0.0  ;;  %v1106_v53 = vsel %vm618_vm2, %v1078_v47, 0.0  ;;  %v1083_v49 = vrot.slane %v5341_v31, 3  ;;  %v1093_v50 = vrot.slane %v1092_v41, 4 }
  0xcb   : > { %v1100_v5 = vrot.slane %v1099_v51, 4  ;;  %v1107_v9 = vrot.slane %v1106_v53, 4  ;;  %v1113_v15 = vsel %vm618_vm2, %v1079_v56, 0.0  ;;  %v1120_v55 = vsel %vm618_vm2, %v1080_v19, 0.0 }
  0xcc   : > { %4057 = vmatpush3.bf16.msra.mxu1 %v5257_v22  ;;  %v1127_v39 = vsel %vm618_vm2, %v1081_v33, 0.0  ;;  %v1134_v57 = vsel %vm618_vm2, %v1082_v29, 0.0  ;;  %v1094_v3 = vadd.f32 %v1093_v50, %v1092_v41  ;;  %v1114_v10 = vrot.slane %v1113_v15, 4 }
  0xcd   : > { %4058 = vmatprep.subr.bf16.mxu1 %v6195_v52  ;;  %v1101_v58 = vadd.f32 %v1100_v5, %v1099_v51  ;;  %v1108_v37 = vadd.f32 %v1107_v9, %v1106_v53  ;;  %v1121_v7 = vrot.slane %v1120_v55, 4  ;;  %v1128_v17 = vrot.slane %v1127_v39, 4 }
  0xce   : > { %v1135_v43 = vrot.slane %v1134_v57, 4  ;;  %v1141_v45 = vsel %vm618_vm2, %v1083_v49, 0.0  ;;  %v1095_v22 = vrot.slane %v1094_v3, 2  ;;  %v1115_v11 = vadd.f32 %v1114_v10, %v1113_v15 }
  0xcf   : > { %v1102_v26 = vrot.slane %v1101_v58, 2  ;;  %v1109_v8 = vrot.slane %v1108_v37, 2  ;;  %v1122_v18 = vadd.f32 %v1121_v7, %v1120_v55  ;;  %v1129_v14 = vadd.f32 %v1128_v17, %v1127_v39 }
  0xd0   : > { %4059 = vmatpush3.bf16.msra.mxu1 %v5265_v1  ;;  %v1136_v40 = vadd.f32 %v1135_v43, %v1134_v57  ;;  %v1142_v21 = vrot.slane %v1141_v45, 4  ;;  %v1096_v35 = vadd.f32 %v1095_v22, %v1094_v3  ;;  %v1116_v12 = vrot.slane %v1115_v11, 2 }
  0xd1   : > { %4060 = vmatprep.subr.bf16.mxu1 %v6195_v52  ;;  %v1103_v2 = vadd.f32 %v1102_v26, %v1101_v58  ;;  %v1110_v28 = vadd.f32 %v1109_v8, %v1108_v37  ;;  %v1123_v16 = vrot.slane %v1122_v18, 2  ;;  %v1130_v46 = vrot.slane %v1129_v14, 2 }
  0xd2   : > { %v1137_v44 = vrot.slane %v1136_v40, 2  ;;  %v1143_v62 = vadd.f32 %v1142_v21, %v1141_v45  ;;  %v1097_v24 = vrot.slane %v1096_v35, 1  ;;  %v1117_v25 = vadd.f32 %v1116_v12, %v1115_v11  ;;  %v4167_v45 = vld [vmem:[%s6135_s3 + $0xc] ss:$24 sps:$4 sm:$0xff]  }
  0xd3   : > { %v1104_v60 = vrot.slane %v1103_v2, 1  ;;  %v1111_v27 = vrot.slane %v1110_v28, 1  ;;  %v1124_v1 = vadd.f32 %v1123_v16, %v1122_v18  ;;  %v1131_v54 = vadd.f32 %v1130_v46, %v1129_v14 }
  0xd4   : > { %4061 = vmatpush3.bf16.msra.mxu1 %v5278_v4  ;;  %v1138_v20 = vadd.f32 %v1137_v44, %v1136_v40  ;;  %v1144_v30 = vrot.slane %v1143_v62, 2  ;;  %v5362_v23 = vadd.f32 %v1097_v24, %v1096_v35  ;;  %v1118_v47 = vrot.slane %v1117_v25, 1 }
  0xd5   : > { %4062 = vmatprep.subr.bf16.mxu1 %v6195_v52  ;;  %v5364_v48 = vadd.f32 %v1104_v60, %v1103_v2  ;;  %v5366_v38 = vadd.f32 %v1111_v27, %v1110_v28  ;;  %v1125_v56 = vrot.slane %v1124_v1, 1  ;;  %v1132_v19 = vrot.slane %v1131_v54, 1 }
  0xd6   : > { %v1139_v33 = vrot.slane %v1138_v20, 1  ;;  %v1145_v29 = vadd.f32 %v1144_v30, %v1143_v62  ;;  %v5368_v41 = vadd.f32 %v1118_v47, %v1117_v25  ;;  %v1148_v4 = vrot.slane %v5320_v0, 5 }
  0xd7   : > { %v1149_v51 = vrot.slane %v5322_v36, 5  ;;  %v1150_v53 = vrot.slane %v5324_v6, 5  ;;  %v5374_v49 = vadd.f32 %v1125_v56, %v1124_v1  ;;  %v5376_v50 = vadd.f32 %v1132_v19, %v1131_v54 }
  0xd8   : > { %4063 = vmatpush3.bf16.msra.mxu1 %v5291_v13  ;;  %v5378_v5 = vadd.f32 %v1139_v33, %v1138_v20  ;;  %v1146_v9 = vrot.slane %v1145_v29, 1  ;;  %v1151_v15 = vrot.slane %v5327_v59, 5  ;;  %v1152_v55 = vrot.slane %v5329_v34, 5 }
  0xd9   : > { %4064 = vmatprep.subr.bf16.mxu1 %v6195_v52  ;;  %v1153_v39 = vrot.slane %v5331_v61, 5  ;;  %v1154_v57 = vrot.slane %v5335_v32, 5  ;;  %v1155_v13 = vrot.slane %v5341_v31, 5  ;;  %v1164_v58 = vsel %vm537_vm1, %v1148_v4, 0.0 }
  0xda   : > { %v5385_v3 = vadd.f32 %v1146_v9, %v1145_v29  ;;  %v1171_v37 = vsel %vm537_vm1, %v1149_v51, 0.0  ;;  %v1165_v10 = vrot.slane %v1164_v58, 4  ;;  %v1178_v17 = vsel %vm537_vm1, %v1150_v53, 0.0 }
  0xdb   : > { %v1172_v7 = vrot.slane %v1171_v37, 4  ;;  %v1185_v43 = vsel %vm537_vm1, %v1151_v15, 0.0  ;;  %v1179_v22 = vrot.slane %v1178_v17, 4  ;;  %v1192_v8 = vsel %vm537_vm1, %v1152_v55, 0.0 }
  0xdc   : > { %4065 = vmatpush3.bf16.msra.mxu1 %v5300_v42  ;;  %v1186_v26 = vrot.slane %v1185_v43, 4  ;;  %v1199_v11 = vsel %vm537_vm1, %v1153_v39, 0.0  ;;  %v1166_v18 = vadd.f32 %v1165_v10, %v1164_v58  ;;  %v1193_v40 = vrot.slane %v1192_v8, 4 }
  0xdd   : > { %4066 = vmatprep.subr.bf16.mxu1 %v6195_v52  ;;  %v1173_v14 = vadd.f32 %v1172_v7, %v1171_v37  ;;  %v1200_v21 = vrot.slane %v1199_v11, 4  ;;  %v1180_v35 = vadd.f32 %v1179_v22, %v1178_v17  ;;  %v1206_v28 = vsel %vm537_vm1, %v1154_v57, 0.0 }
  0xde   : > { %v1187_v2 = vadd.f32 %v1186_v26, %v1185_v43  ;;  %v1213_v12 = vsel %vm537_vm1, %v1155_v13, 0.0  ;;  %v1167_v16 = vrot.slane %v1166_v18, 2  ;;  %v1194_v46 = vadd.f32 %v1193_v40, %v1192_v8 }
  0xdf   : > { %v1174_v42 = vrot.slane %v1173_v14, 2  ;;  %v1201_v44 = vadd.f32 %v1200_v21, %v1199_v11  ;;  %v1181_v62 = vrot.slane %v1180_v35, 2  ;;  %v1207_v60 = vrot.slane %v1206_v28, 4 }
  0xe0   : > { %4067 = vmatpush3.bf16.msra.mxu1 %v5308_v63  ;;  %v1188_v24 = vrot.slane %v1187_v2, 2  ;;  %v1214_v52 = vrot.slane %v1213_v12, 4  ;;  %v1168_v27 = vadd.f32 %v1167_v16, %v1166_v18  ;;  %v1195_v1 = vrot.slane %v1194_v46, 2 }
  0xe1   : > { %v1175_v25 = vadd.f32 %v1174_v42, %v1173_v14  ;;  %v1202_v54 = vrot.slane %v1201_v44, 2  ;;  %2682 = vmatprep.subr.bf16.mxu1 %v4167_v45  ;;  %v1182_v20 = vadd.f32 %v1181_v62, %v1180_v35  ;;  %v1208_v47 = vadd.f32 %v1207_v60, %v1206_v28 }
  0xe2   : > { %v1189_v30 = vadd.f32 %v1188_v24, %v1187_v2  ;;  %v1215_v56 = vadd.f32 %v1214_v52, %v1213_v12  ;;  %v1169_v19 = vrot.slane %v1168_v27, 1  ;;  %v1196_v29 = vadd.f32 %v1195_v1, %v1194_v46 }
  0xe3   : > { %v1176_v33 = vrot.slane %v1175_v25, 1  ;;  %v1203_v4 = vadd.f32 %v1202_v54, %v1201_v44  ;;  %v1183_v51 = vrot.slane %v1182_v20, 1  ;;  %v1209_v63 = vrot.slane %v1208_v47, 2 }
  0xe4   : > { %v1190_v53 = vrot.slane %v1189_v30, 1  ;;  %v1216_v9 = vrot.slane %v1215_v56, 2  ;;  %v1170_v15 = vadd.f32 %v1169_v19, %v1168_v27  ;;  %v1197_v39 = vrot.slane %v1196_v29, 1 }
  0xe5   : > { %v1177_v55 = vadd.f32 %v1176_v33, %v1175_v25  ;;  %v1204_v57 = vrot.slane %v1203_v4, 1  ;;  %v1184_v13 = vadd.f32 %v1183_v51, %v1182_v20  ;;  %v1210_v37 = vadd.f32 %v1209_v63, %v1208_v47 }
  0xe6   : > { %v1191_v58 = vadd.f32 %v1190_v53, %v1189_v30  ;;  %v1217_v10 = vadd.f32 %v1216_v9, %v1215_v56  ;;  %v1198_v7 = vadd.f32 %v1197_v39, %v1196_v29  ;;  %v1228_v43 = vadd.f32 %v1170_v15, %v5362_v23 }
  0xe7   : > { %v1205_v17 = vadd.f32 %v1204_v57, %v1203_v4  ;;  %v1229_v45 = vadd.f32 %v1177_v55, %v5364_v48  ;;  %v1211_v22 = vrot.slane %v1210_v37, 1  ;;  %v1230_v8 = vadd.f32 %v1184_v13, %v5366_v38 }
  0xe8   : > { %v1218_v26 = vrot.slane %v1217_v10, 1  ;;  %v1231_v11 = vadd.f32 %v1191_v58, %v5368_v41  ;;  %v1232_v18 = vadd.f32 %v1198_v7, %v5374_v49  ;;  %v1309_v40 = vpack.c.bf16 %v1228_v43, %v1228_v43  ;;  %v4173_v58 = vld [vmem:[%s6135_s3 + $0x3c] ss:$24 sps:$4 sm:$0xff]  }
  0xe9   : > { %v1233_v14 = vadd.f32 %v1205_v17, %v5376_v50  ;;  %v1310_v21 = vpack.c.bf16 %v1229_v45, %v1229_v45  ;;  %v1212_v35 = vadd.f32 %v1211_v22, %v1210_v37  ;;  %v1311_v28 = vpack.c.bf16 %v1230_v8, %v1230_v8 }
  0xea   : > { %v1219_v2 = vadd.f32 %v1218_v26, %v1217_v10  ;;  %v1312_v12 = vpack.c.bf16 %v1231_v11, %v1231_v11  ;;  %v1313_v16 = vpack.c.bf16 %v1232_v18, %v1232_v18  ;;  %v1325_v46 = vunpack.c.l.b16 %v1309_v40 }
  0xeb   : > { %v1314_v42 = vpack.c.bf16 %v1233_v14, %v1233_v14  ;;  %v1326_v44 = vunpack.c.l.b16 %v1310_v21  ;;  %v1234_v62 = vadd.f32 %v1212_v35, %v5378_v5  ;;  %v1327_v60 = vunpack.c.l.b16 %v1311_v28 }
  0xec   : > { %v1235_v24 = vadd.f32 %v1219_v2, %v5385_v3  ;;  %v1328_v52 = vunpack.c.l.b16 %v1312_v12  ;;  %v1329_v27 = vunpack.c.l.b16 %v1313_v16  ;;  %v1012_v54 = vsel %vm537_vm1, %v5320_v0, 0.0  ;;  %v4179_v2 = vld [vmem:[%s6135_s3 + $0x6c] ss:$24 sps:$4 sm:$0xff]  }
  0xed   : > { %v1330_v25 = vunpack.c.l.b16 %v1314_v42  ;;  %v1333_v1 = vsel %vm803_vm3, %v1326_v44, %v1325_v46  ;;  %v1315_v20 = vpack.c.bf16 %v1234_v62, %v1234_v62  ;;  %v1013_v56 = vrot.slane %v1012_v54, 4 }
  0xee   : > { %v1316_v30 = vpack.c.bf16 %v1235_v24, %v1235_v24  ;;  %v1334_v47 = vsel %vm805_vm4, %v1327_v60, %v1333_v1  ;;  %v1019_v33 = vsel %vm537_vm1, %v5322_v36, 0.0  ;;  %v1026_v29 = vsel %vm537_vm1, %v5324_v6, 0.0  ;;  %v4165_v36 = vld [vmem:[%s6135_s3 + $0x8] ss:$24 sps:$4 sm:$0xff]  }
  0xef   : > { %v1335_v19 = vsel %vm807_vm5, %v1328_v52, %v1334_v47  ;;  %v1033_v4 = vsel %vm537_vm1, %v5327_v59, 0.0  ;;  %v1331_v51 = vunpack.c.l.b16 %v1315_v20  ;;  %v1014_v63 = vadd.f32 %v1013_v56, %v1012_v54 }
  0xf0   : > { %v1332_v53 = vunpack.c.l.b16 %v1316_v30  ;;  %v1336_v0 = vsel %vm809_vm6, %v1329_v27, %v1335_v19  ;;  %v1020_v15 = vrot.slane %v1019_v33, 4  ;;  %v1027_v55 = vrot.slane %v1026_v29, 4 }
  0xf1   : > { %v1337_v9 = vsel %vm811_vm7, %v1330_v25, %v1336_v0  ;;  %v1034_v39 = vrot.slane %v1033_v4, 4  ;;  %v1015_v6 = vrot.slane %v1014_v63, 2  ;;  %v1040_v59 = vsel %vm537_vm1, %v5329_v34, 0.0  ;;  %v4177_v25 = vld [vmem:[%s6135_s3 + $0x68] ss:$24 sps:$4 sm:$0xff]  }
  0xf2   : > { %v1338_v57 = vsel %vm813_vm8, %v1331_v51, %v1337_v9  ;;  %v1047_v13 = vsel %vm537_vm1, %v5331_v61, 0.0  ;;  %v1021_v10 = vadd.f32 %v1020_v15, %v1019_v33  ;;  %v1028_v7 = vadd.f32 %v1027_v55, %v1026_v29  ;;  %v4171_v61 = vld [vmem:[%s6135_s3 + $0x38] ss:$24 sps:$4 sm:$0xff]  }
  0xf3   : > { %v1339_v37 = vsel %vm815_vm9, %v1332_v53, %v1338_v57  ;;  %v1035_v17 = vadd.f32 %v1034_v39, %v1033_v4  ;;  %v1016_v45 = vadd.f32 %v1015_v6, %v1014_v63  ;;  %v1041_v22 = vrot.slane %v1040_v59, 4 }
  0xf4   : > { %v1340_v43 = vpack.c.b16 %v1339_v37, %v1339_v37  ;;  %v1048_v26 = vrot.slane %v1047_v13, 4  ;;  %v1022_v8 = vrot.slane %v1021_v10, 2  ;;  %v1029_v11 = vrot.slane %v1028_v7, 2 }
  0xf5   : > { %v1036_v18 = vrot.slane %v1035_v17, 2  ;;  %v1054_v34 = vsel %vm537_vm1, %v5335_v32, 0.0  ;;  %v1017_v14 = vrot.slane %v1016_v45, 1  ;;  %v1042_v40 = vadd.f32 %v1041_v22, %v1040_v59 }
  0xf6   : > { %4069 = vmatmul.mubr.bf16.vlgmr.msra.gmra.mrb[4].mxu1 %v1340_v43  ;;  %v1049_v21 = vadd.f32 %v1048_v26, %v1047_v13  ;;  %v1055_v35 = vrot.slane %v1054_v34, 4  ;;  %v1023_v28 = vadd.f32 %v1022_v8, %v1021_v10  ;;  %v1030_v12 = vadd.f32 %v1029_v11, %v1028_v7 }
  0xf7   : > { %v1037_v16 = vadd.f32 %v1036_v18, %v1035_v17  ;;  %v1061_v42 = vsel %vm537_vm1, %v5341_v31, 0.0  ;;  %2683 = vmatpush1.bf16.msra.mxu1 %v4165_v36  ;;  %v1018_v32 = vadd.f32 %v1017_v14, %v1016_v45  ;;  %v1043_v46 = vrot.slane %v1042_v40, 2  ;;  %v4185_v31 = vld [vmem:[%s6135_s3 + $0x9c] ss:$24 sps:$4 sm:$0xff]  }
  0xf8   : > { %v1050_v44 = vrot.slane %v1049_v21, 2  ;;  %v1056_v62 = vadd.f32 %v1055_v35, %v1054_v34  ;;  %2684 = vmatprep.subr.bf16.mxu1 %v4173_v58  ;;  %v1024_v24 = vrot.slane %v1023_v28, 1  ;;  %v1031_v60 = vrot.slane %v1030_v12, 1  ;;  %v4183_v58 = vld [vmem:[%s6135_s3 + $0x98] ss:$24 sps:$4 sm:$0xff]  }
  0xf9   : > { %v1038_v52 = vrot.slane %v1037_v16, 1  ;;  %v1062_v27 = vrot.slane %v1061_v42, 4  ;;  %v1044_v1 = vadd.f32 %v1043_v46, %v1042_v40  ;;  %v1220_v30 = vadd.f32 %v5362_v23, %v1018_v32  ;;  %v4162_v46 = vld [vmem:[%s6135_s3] ss:$24 sps:$4 sm:$0xff]  }
  0xfa   : > { %v1051_v54 = vadd.f32 %v1050_v44, %v1049_v21  ;;  %v1057_v20 = vrot.slane %v1056_v62, 2  ;;  %v1025_v47 = vadd.f32 %v1024_v24, %v1023_v28  ;;  %v1032_v56 = vadd.f32 %v1031_v60, %v1030_v12  ;;  %v4195_v12 = vld [vmem:[%s6135_s3 + $0xf8] ss:$24 sps:$4 sm:$0xff]   ;;  %v4201_v44 = vld [vmem:[%s6135_s3 + $0x128] ss:$24 sps:$4 sm:$0xff]  }
  0xfb   : > { %v1039_v19 = vadd.f32 %v1038_v52, %v1037_v16  ;;  %v1063_v33 = vadd.f32 %v1062_v27, %v1061_v42  ;;  %2685 = vmatpush1.bf16.msra.mxu1 %v4171_v61  ;;  %v1045_v29 = vrot.slane %v1044_v1, 1  ;;  %v1236_v53 = vpack.c.bf16 %v1220_v30, %v1220_v30  ;;  %v4170_v24 = vld [vmem:[%s6135_s3 + $0x34] ss:$24 sps:$4 sm:$0xff]   ;;  %v4168_v52 = vld [vmem:[%s6135_s3 + $0x30] ss:$24 sps:$4 sm:$0xff]  }
  0xfc   : > { %v1052_v4 = vrot.slane %v1051_v54, 1  ;;  %v1058_v51 = vadd.f32 %v1057_v20, %v1056_v62  ;;  %2686 = vmatprep.subr.bf16.mxu1 %v4179_v2  ;;  %v1221_v63 = vadd.f32 %v5364_v48, %v1025_v47  ;;  %v1222_v9 = vadd.f32 %v5366_v38, %v1032_v56  ;;  %v4209_v60 = vld [vmem:[%s6135_s3 + $0x15c] ss:$24 sps:$4 sm:$0xff]   ;;  %v4207_v27 = vld [vmem:[%s6135_s3 + $0x158] ss:$24 sps:$4 sm:$0xff]  }
  0xfd   : > { %v1064_v0 = vrot.slane %v1063_v33, 2  ;;  %v1223_v23 = vadd.f32 %v5368_v41, %v1039_v19  ;;  %v1046_v15 = vadd.f32 %v1045_v29, %v1044_v1  ;;  %v1252_v36 = vunpack.c.l.b16 %v1236_v53  ;;  %v4191_v41 = vld [vmem:[%s6135_s3 + $0xcc] ss:$24 sps:$4 sm:$0xff]   ;;  %v4213_v20 = vld [vmem:[%s6135_s3 + $0x188] ss:$24 sps:$4 sm:$0xff]  }
  0xfe   : > { %v1053_v55 = vadd.f32 %v1052_v4, %v1051_v54  ;;  %v1059_v39 = vrot.slane %v1058_v51, 1  ;;  %v1237_v6 = vpack.c.bf16 %v1221_v63, %v1221_v63  ;;  %v1238_v59 = vpack.c.bf16 %v1222_v9, %v1222_v9  ;;  %v4215_v1 = vld [vmem:[%s6135_s3 + $0x18c] ss:$24 sps:$4 sm:$0xff]   ;;  %v4174_v54 = vld [vmem:[%s6135_s3 + $0x60] ss:$24 sps:$4 sm:$0xff]  }
  0xff   : > { %v1065_v57 = vadd.f32 %v1064_v0, %v1063_v33  ;;  %v1239_v13 = vpack.c.bf16 %v1223_v23, %v1223_v23  ;;  %2687 = vmatpush1.bf16.msra.mxu1 %v4177_v25  ;;  %v1224_v48 = vadd.f32 %v5374_v49, %v1046_v15  ;;  %v4189_v49 = vld [vmem:[%s6135_s3 + $0xc8] ss:$24 sps:$4 sm:$0xff]   ;;  %v4176_v25 = vld [vmem:[%s6135_s3 + $0x64] ss:$24 sps:$4 sm:$0xff]   ;;  %v4182_v30 = vld [vmem:[%s6135_s3 + $0x94] ss:$24 sps:$4 sm:$0xff]  }
 0x100   : > { %v1060_v37 = vadd.f32 %v1059_v39, %v1058_v51  ;;  %v1225_v38 = vadd.f32 %v5376_v50, %v1053_v55  ;;  %2688 = vmatprep.subr.bf16.mxu1 %v4185_v31  ;;  %v1253_v7 = vunpack.c.l.b16 %v1237_v6  ;;  %v1254_v17 = vunpack.c.l.b16 %v1238_v59  ;;  %v4221_v31 = vld [vmem:[%s6135_s3 + $0x1bc] ss:$24 sps:$4 sm:$0xff]   ;;  %v4180_v47 = vld [vmem:[%s6135_s3 + $0x90] ss:$24 sps:$4 sm:$0xff]   ;;  %v4227_v33 = vld [vmem:[%s6135_s3 + $0x1ec] ss:$24 sps:$4 sm:$0xff]  }
 0x101   : > { %v1066_v10 = vrot.slane %v1065_v57, 1  ;;  %v1255_v43 = vunpack.c.l.b16 %v1239_v13  ;;  %v1240_v22 = vpack.c.bf16 %v1224_v48, %v1224_v48  ;;  %v4219_v56 = vld [vmem:[%s6135_s3 + $0x1b8] ss:$24 sps:$4 sm:$0xff]   ;;  %v4188_v19 = vld [vmem:[%s6135_s3 + $0xc4] ss:$24 sps:$4 sm:$0xff]  }
 0x102   : > { %v1226_v45 = vadd.f32 %v5378_v5, %v1060_v37  ;;  %v1241_v26 = vpack.c.bf16 %v1225_v38, %v1225_v38  ;;  %v1260_v11 = vsel %vm803_vm3, %v1253_v7, %v1252_v36  ;;  %v4197_v5 = vld [vmem:[%s6135_s3 + $0xfc] ss:$24 sps:$4 sm:$0xff]   ;;  %v4186_v29 = vld [vmem:[%s6135_s3 + $0xc0] ss:$24 sps:$4 sm:$0xff]   ;;  %v4192_v0 = vld [vmem:[%s6135_s3 + $0xf0] ss:$24 sps:$4 sm:$0xff]  }
 0x103   : > { %v1067_v8 = vadd.f32 %v1066_v10, %v1065_v57  ;;  %2689 = vmatpush1.bf16.msra.mxu1 %v4183_v58  ;;  %v1256_v18 = vunpack.c.l.b16 %v1240_v22  ;;  %v1261_v61 = vsel %vm805_vm4, %v1254_v17, %v1260_v11  ;;  %v4225_v4 = vld [vmem:[%s6135_s3 + $0x1e8] ss:$24 sps:$4 sm:$0xff]   ;;  %v4194_v51 = vld [vmem:[%s6135_s3 + $0xf4] ss:$24 sps:$4 sm:$0xff]   ;;  %v4231_v63 = vld [vmem:[%s6135_s3 + $0x218] ss:$24 sps:$4 sm:$0xff]  }
 0x104   : > { %v1242_v50 = vpack.c.bf16 %v1226_v45, %v1226_v45  ;;  %v1257_v34 = vunpack.c.l.b16 %v1241_v26  ;;  %2690 = vmatprep.subr.bf16.mxu1 %v4191_v41  ;;  %v1262_v40 = vsel %vm807_vm5, %v1255_v43, %v1261_v61  ;;  %v4233_v53 = vld [vmem:[%s6135_s3 + $0x21c] ss:$24 sps:$4 sm:$0xff]   ;;  %v4239_v23 = vld [vmem:[%s6135_s3 + $0x24c] ss:$24 sps:$4 sm:$0xff]   ;;  %v4198_v15 = vld [vmem:[%s6135_s3 + $0x120] ss:$24 sps:$4 sm:$0xff]  }
 0x105   : > { %v1227_v14 = vadd.f32 %v5385_v3, %v1067_v8  ;;  %v1263_v35 = vsel %vm809_vm6, %v1256_v18, %v1262_v40  ;;  %v4203_v3 = vld [vmem:[%s6135_s3 + $0x12c] ss:$24 sps:$4 sm:$0xff]   ;;  %v4237_v55 = vld [vmem:[%s6135_s3 + $0x248] ss:$24 sps:$4 sm:$0xff]   ;;  %v4245_v36 = vld [vmem:[%s6135_s3 + $0x27c] ss:$24 sps:$4 sm:$0xff]  }
 0x106   : > { %v1258_v21 = vunpack.c.l.b16 %v1242_v50  ;;  %v1264_v28 = vsel %vm811_vm7, %v1257_v34, %v1263_v35  ;;  %v4200_v9 = vld [vmem:[%s6135_s3 + $0x124] ss:$24 sps:$4 sm:$0xff]   ;;  %v4206_v39 = vld [vmem:[%s6135_s3 + $0x154] ss:$24 sps:$4 sm:$0xff]   ;;  %v4204_v57 = vld [vmem:[%s6135_s3 + $0x150] ss:$24 sps:$4 sm:$0xff]  }
 0x107   : > { %v1243_v2 = vpack.c.bf16 %v1227_v14, %v1227_v14  ;;  %2691 = vmatpush1.bf16.msra.mxu1 %v4189_v49  ;;  %v4243_v6 = vld [vmem:[%s6135_s3 + $0x278] ss:$24 sps:$4 sm:$0xff]   ;;  %v4212_v59 = vld [vmem:[%s6135_s3 + $0x184] ss:$24 sps:$4 sm:$0xff]   ;;  %v4249_v37 = vld [vmem:[%s6135_s3 + $0x2a8] ss:$24 sps:$4 sm:$0xff]  }
 0x108   : > { %v1265_v16 = vsel %vm813_vm8, %v1258_v21, %v1264_v28  ;;  %2692 = vmatprep.subr.bf16.mxu1 %v4197_v5  ;;  %v4251_v13 = vld [vmem:[%s6135_s3 + $0x2ac] ss:$24 sps:$4 sm:$0xff]   ;;  %v4210_v58 = vld [vmem:[%s6135_s3 + $0x180] ss:$24 sps:$4 sm:$0xff]   ;;  %v4257_v38 = vld [vmem:[%s6135_s3 + $0x2dc] ss:$24 sps:$4 sm:$0xff]  }
 0x109   : > { %v1259_v42 = vunpack.c.l.b16 %v1243_v2  ;;  %v4218_v48 = vld [vmem:[%s6135_s3 + $0x1b4] ss:$24 sps:$4 sm:$0xff]   ;;  %v4216_v41 = vld [vmem:[%s6135_s3 + $0x1b0] ss:$24 sps:$4 sm:$0xff]   ;;  %v4224_v7 = vld [vmem:[%s6135_s3 + $0x1e4] ss:$24 sps:$4 sm:$0xff]   ;;  %v1384_v2 = vlaneseq }
 0x10a   : > { %v4255_v10 = vld [vmem:[%s6135_s3 + $0x2d8] ss:$24 sps:$4 sm:$0xff]   ;;  %v4263_v17 = vld [vmem:[%s6135_s3 + $0x30c] ss:$24 sps:$4 sm:$0xff]  }
 0x10b   : > { %v1266_v32 = vsel %vm815_vm9, %v1259_v42, %v1265_v16  ;;  %2693 = vmatpush1.bf16.msra.mxu1 %v4195_v12  ;;  %v4222_v43 = vld [vmem:[%s6135_s3 + $0x1e0] ss:$24 sps:$4 sm:$0xff]   ;;  %v4230_v45 = vld [vmem:[%s6135_s3 + $0x214] ss:$24 sps:$4 sm:$0xff]   ;;  %v4228_v22 = vld [vmem:[%s6135_s3 + $0x210] ss:$24 sps:$4 sm:$0xff]  }
 0x10c   : > { %v1267_v62 = vpack.c.b16 %v1266_v32, %v1266_v32  ;;  %2694 = vmatprep.subr.bf16.mxu1 %v4203_v3  ;;  %v4236_v26 = vld [vmem:[%s6135_s3 + $0x244] ss:$24 sps:$4 sm:$0xff]   ;;  %v4234_v8 = vld [vmem:[%s6135_s3 + $0x240] ss:$24 sps:$4 sm:$0xff]   ;;  %v4242_v11 = vld [vmem:[%s6135_s3 + $0x274] ss:$24 sps:$4 sm:$0xff]  }
 0x10d   : > { %v4240_v49 = vld [vmem:[%s6135_s3 + $0x270] ss:$24 sps:$4 sm:$0xff]   ;;  %v4248_v50 = vld [vmem:[%s6135_s3 + $0x2a4] ss:$24 sps:$4 sm:$0xff]   ;;  %v4246_v18 = vld [vmem:[%s6135_s3 + $0x2a0] ss:$24 sps:$4 sm:$0xff]  }
 0x10e   : > { %4049 = vmatmul.mubr.bf16.vlgmr.msra.gmra.mrb[4].mxu0 %v1267_v62  ;;  %v4254_v34 = vld [vmem:[%s6135_s3 + $0x2d4] ss:$24 sps:$4 sm:$0xff]   ;;  %v4252_v61 = vld [vmem:[%s6135_s3 + $0x2d0] ss:$24 sps:$4 sm:$0xff]   ;;  %v4260_v5 = vld [vmem:[%s6135_s3 + $0x304] ss:$24 sps:$4 sm:$0xff]  }
 0x10f   : > { %2601 = vmatpush1.bf16.msra.mxu0 %v4162_v46  ;;  %2695 = vmatpush1.bf16.msra.mxu1 %v4201_v44  ;;  %v5640_v28 = vshrl.u32 %v1384_v2, 7  ;;  %v5646_v16 = vld [vmem:[%s6134_s2] sm:$0xf]  ;;  %v4327_v2 = vld [vmem:[%s6135_s3 + $0x518] ss:$24 sps:$4 sm:$0xff]  }
 0x110   : > { %2602 = vmatprep.subr.bf16.mxu0 %v4170_v24  ;;  %2696 = vmatprep.subr.bf16.mxu1 %v4209_v60 }
 0x111   : > { %v1386_v12 = vsub.s32 0, %v5640_v28  ;;  %v1390_v42 = vsub.s32 1, %v5640_v28 }
 0x113   : > { %2603 = vmatpush1.bf16.msra.mxu0 %v4168_v52  ;;  %2697 = vmatpush1.bf16.msra.mxu1 %v4207_v27  ;;  %v1387_v3 = vrot.slane %v5646_v16, %v1386_v12  ;;  %v1391_v46 = vrot.slane %v5646_v16, %v1390_v42 }
 0x114   : > { %2604 = vmatprep.subr.bf16.mxu0 %v4176_v25  ;;  %2698 = vmatprep.subr.bf16.mxu1 %v4215_v1 }
 0x117   : > { %2605 = vmatpush1.bf16.msra.mxu0 %v4174_v54  ;;  %2699 = vmatpush1.bf16.msra.mxu1 %v4213_v20  ;;  %v4258_v20 = vld [vmem:[%s6135_s3 + $0x300] ss:$24 sps:$4 sm:$0xff]  }
 0x118   : > { %2606 = vmatprep.subr.bf16.mxu0 %v4182_v30  ;;  %2700 = vmatprep.subr.bf16.mxu1 %v4221_v31  ;;  %v4261_v30 = vld [vmem:[%s6135_s3 + $0x308] ss:$24 sps:$4 sm:$0xff]   ;;  %v4266_v31 = vld [vmem:[%s6135_s3 + $0x334] ss:$24 sps:$4 sm:$0xff]  }
 0x11b   : > { %2607 = vmatpush1.bf16.msra.mxu0 %v4180_v47  ;;  %2701 = vmatpush1.bf16.msra.mxu1 %v4219_v56  ;;  %v4269_v47 = vld [vmem:[%s6135_s3 + $0x33c] ss:$24 sps:$4 sm:$0xff]   ;;  %v4264_v56 = vld [vmem:[%s6135_s3 + $0x330] ss:$24 sps:$4 sm:$0xff]  }
 0x11c   : > { %2608 = vmatprep.subr.bf16.mxu0 %v4188_v19  ;;  %2702 = vmatprep.subr.bf16.mxu1 %v4227_v33  ;;  %v4267_v19 = vld [vmem:[%s6135_s3 + $0x338] ss:$24 sps:$4 sm:$0xff]   ;;  %v4272_v33 = vld [vmem:[%s6135_s3 + $0x364] ss:$24 sps:$4 sm:$0xff]  }
 0x11f   : > { %2609 = vmatpush1.bf16.msra.mxu0 %v4186_v29  ;;  %2703 = vmatpush1.bf16.msra.mxu1 %v4225_v4  ;;  %v4275_v29 = vld [vmem:[%s6135_s3 + $0x36c] ss:$24 sps:$4 sm:$0xff]   ;;  %v4270_v4 = vld [vmem:[%s6135_s3 + $0x360] ss:$24 sps:$4 sm:$0xff]  }
 0x120   : > { %2610 = vmatprep.subr.bf16.mxu0 %v4194_v51  ;;  %2704 = vmatprep.subr.bf16.mxu1 %v4233_v53  ;;  %v4273_v51 = vld [vmem:[%s6135_s3 + $0x368] ss:$24 sps:$4 sm:$0xff]   ;;  %v4278_v53 = vld [vmem:[%s6135_s3 + $0x394] ss:$24 sps:$4 sm:$0xff]  }
 0x123   : > { %2611 = vmatpush1.bf16.msra.mxu0 %v4192_v0  ;;  %2705 = vmatpush1.bf16.msra.mxu1 %v4231_v63  ;;  %v4281_v0 = vld [vmem:[%s6135_s3 + $0x39c] ss:$24 sps:$4 sm:$0xff]   ;;  %v4276_v63 = vld [vmem:[%s6135_s3 + $0x390] ss:$24 sps:$4 sm:$0xff]  }
 0x124   : > { %2612 = vmatprep.subr.bf16.mxu0 %v4200_v9  ;;  %2706 = vmatprep.subr.bf16.mxu1 %v4239_v23  ;;  %v4279_v9 = vld [vmem:[%s6135_s3 + $0x398] ss:$24 sps:$4 sm:$0xff]   ;;  %v4284_v23 = vld [vmem:[%s6135_s3 + $0x3c4] ss:$24 sps:$4 sm:$0xff]  }
 0x127   : > { %2613 = vmatpush1.bf16.msra.mxu0 %v4198_v15  ;;  %2707 = vmatpush1.bf16.msra.mxu1 %v4237_v55  ;;  %v4287_v15 = vld [vmem:[%s6135_s3 + $0x3cc] ss:$24 sps:$4 sm:$0xff]   ;;  %v4282_v55 = vld [vmem:[%s6135_s3 + $0x3c0] ss:$24 sps:$4 sm:$0xff]  }
 0x128   : > { %2614 = vmatprep.subr.bf16.mxu0 %v4206_v39  ;;  %2708 = vmatprep.subr.bf16.mxu1 %v4245_v36  ;;  %v4285_v39 = vld [vmem:[%s6135_s3 + $0x3c8] ss:$24 sps:$4 sm:$0xff]   ;;  %v4290_v36 = vld [vmem:[%s6135_s3 + $0x3f4] ss:$24 sps:$4 sm:$0xff]  }
 0x12b   : > { %2615 = vmatpush1.bf16.msra.mxu0 %v4204_v57  ;;  %2709 = vmatpush1.bf16.msra.mxu1 %v4243_v6  ;;  %v4293_v57 = vld [vmem:[%s6135_s3 + $0x3fc] ss:$24 sps:$4 sm:$0xff]   ;;  %v4288_v6 = vld [vmem:[%s6135_s3 + $0x3f0] ss:$24 sps:$4 sm:$0xff]  }
 0x12c   : > { %2616 = vmatprep.subr.bf16.mxu0 %v4212_v59  ;;  %2710 = vmatprep.subr.bf16.mxu1 %v4251_v13  ;;  %v4291_v59 = vld [vmem:[%s6135_s3 + $0x3f8] ss:$24 sps:$4 sm:$0xff]   ;;  %v4296_v13 = vld [vmem:[%s6135_s3 + $0x424] ss:$24 sps:$4 sm:$0xff]  }
 0x12f   : > { %2617 = vmatpush1.bf16.msra.mxu0 %v4210_v58  ;;  %2711 = vmatpush1.bf16.msra.mxu1 %v4249_v37  ;;  %v4299_v58 = vld [vmem:[%s6135_s3 + $0x42c] ss:$24 sps:$4 sm:$0xff]   ;;  %v4294_v37 = vld [vmem:[%s6135_s3 + $0x420] ss:$24 sps:$4 sm:$0xff]  }
 0x130   : > { %2618 = vmatprep.subr.bf16.mxu0 %v4218_v48  ;;  %2712 = vmatprep.subr.bf16.mxu1 %v4257_v38  ;;  %v4297_v48 = vld [vmem:[%s6135_s3 + $0x428] ss:$24 sps:$4 sm:$0xff]   ;;  %v4302_v38 = vld [vmem:[%s6135_s3 + $0x454] ss:$24 sps:$4 sm:$0xff]  }
 0x133   : > { %2619 = vmatpush1.bf16.msra.mxu0 %v4216_v41  ;;  %2713 = vmatpush1.bf16.msra.mxu1 %v4255_v10  ;;  %v4305_v41 = vld [vmem:[%s6135_s3 + $0x45c] ss:$24 sps:$4 sm:$0xff]   ;;  %v4300_v10 = vld [vmem:[%s6135_s3 + $0x450] ss:$24 sps:$4 sm:$0xff]  }
 0x134   : > { %2620 = vmatprep.subr.bf16.mxu0 %v4224_v7  ;;  %2723 = vmatprep.subr.bf16.mxu1 %v4263_v17  ;;  %v4303_v7 = vld [vmem:[%s6135_s3 + $0x458] ss:$24 sps:$4 sm:$0xff]   ;;  %v4308_v17 = vld [vmem:[%s6135_s3 + $0x484] ss:$24 sps:$4 sm:$0xff]  }
 0x137   : > { %2621 = vmatpush1.bf16.msra.mxu0 %v4222_v43  ;;  %v4311_v43 = vld [vmem:[%s6135_s3 + $0x48c] ss:$24 sps:$4 sm:$0xff]  }
 0x138   : > { %2622 = vmatprep.subr.bf16.mxu0 %v4230_v45  ;;  %v4306_v45 = vld [vmem:[%s6135_s3 + $0x480] ss:$24 sps:$4 sm:$0xff]  }
 0x13b   : > { %2623 = vmatpush1.bf16.msra.mxu0 %v4228_v22  ;;  %v4309_v22 = vld [vmem:[%s6135_s3 + $0x488] ss:$24 sps:$4 sm:$0xff]  }
 0x13c   : > { %2624 = vmatprep.subr.bf16.mxu0 %v4236_v26  ;;  %v4314_v26 = vld [vmem:[%s6135_s3 + $0x4b4] ss:$24 sps:$4 sm:$0xff]  }
 0x13f   : > { %2625 = vmatpush1.bf16.msra.mxu0 %v4234_v8  ;;  %v4317_v8 = vld [vmem:[%s6135_s3 + $0x4bc] ss:$24 sps:$4 sm:$0xff]  }
 0x140   : > { %2626 = vmatprep.subr.bf16.mxu0 %v4242_v11  ;;  %v4312_v11 = vld [vmem:[%s6135_s3 + $0x4b0] ss:$24 sps:$4 sm:$0xff]  }
 0x143   : > { %2627 = vmatpush1.bf16.msra.mxu0 %v4240_v49  ;;  %v4315_v49 = vld [vmem:[%s6135_s3 + $0x4b8] ss:$24 sps:$4 sm:$0xff]  }
 0x144   : > { %2628 = vmatprep.subr.bf16.mxu0 %v4248_v50  ;;  %v4320_v50 = vld [vmem:[%s6135_s3 + $0x4e4] ss:$24 sps:$4 sm:$0xff]  }
 0x147   : > { %2629 = vmatpush1.bf16.msra.mxu0 %v4246_v18  ;;  %v4323_v18 = vld [vmem:[%s6135_s3 + $0x4ec] ss:$24 sps:$4 sm:$0xff]  }
 0x148   : > { %2630 = vmatprep.subr.bf16.mxu0 %v4254_v34  ;;  %v1398_v34 = vsub.s32 3, %v5640_v28 }
 0x14b   : > { %2631 = vmatpush1.bf16.msra.mxu0 %v4252_v61  ;;  %v4318_v61 = vld [vmem:[%s6135_s3 + $0x4e0] ss:$24 sps:$4 sm:$0xff]  }
 0x14c   : > { %2641 = vmatprep.subr.bf16.mxu0 %v4260_v5  ;;  %v4321_v5 = vld [vmem:[%s6135_s3 + $0x4e8] ss:$24 sps:$4 sm:$0xff]  }
 0x179   : > { %v901_v14 = vpop.f32.mrb[0].mxu0 }
 0x17a   : > { %v4010_v40 = vpop.f32.mrb[1].mxu0  ;;  %v1404_v32 = vadd.f32 %v1387_v3, %v901_v14  ;;  %v4326_v14 = vld [vmem:[%s6135_s3 + $0x514] ss:$24 sps:$4 sm:$0xff]   ;;  %v4332_v3 = vld [vmem:[%s6135_s3 + $0x544] ss:$24 sps:$4 sm:$0xff]  }
 0x17b   : > { %v904_v21 = vpop.f32.mrb[2].mxu0  ;;  %v4329_v40 = vld [vmem:[%s6135_s3 + $0x51c] ss:$24 sps:$4 sm:$0xff]  }
 0x17c   : > { %v4011_v35 = vpop.f32.mrb[3].mxu0  ;;  %v1408_v44 = vmax.f32 %v1404_v32, 0.0  ;;  %v1399_v21 = vrot.slane %v5646_v16, %v1398_v34  ;;  %v4335_v32 = vld [vmem:[%s6135_s3 + $0x54c] ss:$24 sps:$4 sm:$0xff]  }
 0x17d   : > { %v4324_v35 = vld [vmem:[%s6135_s3 + $0x510] ss:$24 sps:$4 sm:$0xff]  }
 0x17e   : > { %v5655_v1 = vpack.c.bf16 %v1408_v44, %v1408_v44 }
 0x196   : > { %v974_v62 = vpop.f32.mrb[0].mxu1 }
 0x197   : > { %v1405_v24 = vadd.f32 %v1391_v46, %v974_v62  ;;  %v4030_v60 = vpop.f32.mrb[1].mxu1 }
 0x198   : > { %v977_v52 = vpop.f32.mrb[2].mxu1  ;;  %v4333_v60 = vld [vmem:[%s6135_s3 + $0x548] ss:$24 sps:$4 sm:$0xff]  }
 0x199   : > { %v1409_v27 = vmax.f32 %v1405_v24, 0.0  ;;  %v4031_v25 = vpop.f32.mrb[3].mxu1  ;;  %v4330_v24 = vld [vmem:[%s6135_s3 + $0x540] ss:$24 sps:$4 sm:$0xff]  }
 0x19a   : > { %v4341_v25 = vld [vmem:[%s6135_s3 + $0x57c] ss:$24 sps:$4 sm:$0xff]  }
 0x19b   : > { %v5657_v54 = vpack.c.bf16 %v1409_v27, %v1409_v27  ;;  %v4338_v27 = vld [vmem:[%s6135_s3 + $0x574] ss:$24 sps:$4 sm:$0xff]  }
 0x19d   : > { %2632 = vmatprep.mubr.bf16.mxu0 %v5657_v54  ;;  %2714 = vmatprep.mubr.bf16.mxu1 %v5657_v54 }
 0x19e   : > { %2633 = vmatmul.mubr.bf16.vlgmr.msra.gmra.mrb[8].mxu0 %v5655_v1  ;;  %2715 = vmatmul.mubr.bf16.vlgmr.msra.gmra.mrb[8].mxu1 %v5655_v1 }
 0x19f   : > { %2642 = vmatpush1.bf16.msra.mxu0 %v4258_v20  ;;  %2724 = vmatpush1.bf16.msra.mxu1 %v4261_v30 }
 0x1a0   : > { %2643 = vmatprep.subr.bf16.mxu0 %v4266_v31  ;;  %2725 = vmatprep.subr.bf16.mxu1 %v4269_v47  ;;  %v4336_v47 = vld [vmem:[%s6135_s3 + $0x570] ss:$24 sps:$4 sm:$0xff]  }
 0x1a3   : > { %2644 = vmatpush1.bf16.msra.mxu0 %v4264_v56  ;;  %2726 = vmatpush1.bf16.msra.mxu1 %v4267_v19  ;;  %v4339_v56 = vld [vmem:[%s6135_s3 + $0x578] ss:$24 sps:$4 sm:$0xff]   ;;  %v4344_v19 = vld [vmem:[%s6135_s3 + $0x5a4] ss:$24 sps:$4 sm:$0xff]  }
 0x1a4   : > { %2645 = vmatprep.subr.bf16.mxu0 %v4272_v33  ;;  %2727 = vmatprep.subr.bf16.mxu1 %v4275_v29  ;;  %v4347_v33 = vld [vmem:[%s6135_s3 + $0x5ac] ss:$24 sps:$4 sm:$0xff]   ;;  %v4342_v29 = vld [vmem:[%s6135_s3 + $0x5a0] ss:$24 sps:$4 sm:$0xff]  }
 0x1a7   : > { %2646 = vmatpush1.bf16.msra.mxu0 %v4270_v4  ;;  %2728 = vmatpush1.bf16.msra.mxu1 %v4273_v51  ;;  %v4345_v4 = vld [vmem:[%s6135_s3 + $0x5a8] ss:$24 sps:$4 sm:$0xff]   ;;  %v4350_v51 = vld [vmem:[%s6135_s3 + $0x5d4] ss:$24 sps:$4 sm:$0xff]  }
 0x1a8   : > { %2647 = vmatprep.subr.bf16.mxu0 %v4278_v53  ;;  %2729 = vmatprep.subr.bf16.mxu1 %v4281_v0  ;;  %v4353_v53 = vld [vmem:[%s6135_s3 + $0x5dc] ss:$24 sps:$4 sm:$0xff]   ;;  %v4348_v0 = vld [vmem:[%s6135_s3 + $0x5d0] ss:$24 sps:$4 sm:$0xff]  }
 0x1ab   : > { %2648 = vmatpush1.bf16.msra.mxu0 %v4276_v63  ;;  %2730 = vmatpush1.bf16.msra.mxu1 %v4279_v9  ;;  %v4351_v63 = vld [vmem:[%s6135_s3 + $0x5d8] ss:$24 sps:$4 sm:$0xff]   ;;  %v4356_v9 = vld [vmem:[%s6135_s3 + $0x14] ss:$24 sps:$4 sm:$0xff]  }
 0x1ac   : > { %2649 = vmatprep.subr.bf16.mxu0 %v4284_v23  ;;  %2731 = vmatprep.subr.bf16.mxu1 %v4287_v15  ;;  %v1394_v23 = vsub.s32 2, %v5640_v28 }
 0x1ae   : > { %v1395_v15 = vrot.slane %v5646_v16, %v1394_v23  ;;  %v4450_v16 = vld [vmem:[#allocation5 + $0x40] sm:$0xff]  }
 0x1af   : > { %2650 = vmatpush1.bf16.msra.mxu0 %v4282_v55  ;;  %2732 = vmatpush1.bf16.msra.mxu1 %v4285_v39 }
 0x1b0   : > { %2651 = vmatprep.subr.bf16.mxu0 %v4290_v36  ;;  %2733 = vmatprep.subr.bf16.mxu1 %v4293_v57 }
 0x1b3   : > { %2652 = vmatpush1.bf16.msra.mxu0 %v4288_v6  ;;  %2734 = vmatpush1.bf16.msra.mxu1 %v4291_v59 }
 0x1b4   : > { %2653 = vmatprep.subr.bf16.mxu0 %v4296_v13  ;;  %2735 = vmatprep.subr.bf16.mxu1 %v4299_v58  ;;  %v4354_v13 = vld [vmem:[%s6135_s3 + $0x10] ss:$24 sps:$4 sm:$0xff]  }
 0x1b7   : > { %2654 = vmatpush1.bf16.msra.mxu0 %v4294_v37  ;;  %2736 = vmatpush1.bf16.msra.mxu1 %v4297_v48  ;;  %v4359_v37 = vld [vmem:[%s6135_s3 + $0x44] ss:$24 sps:$4 sm:$0xff]  }
 0x1b8   : > { %2655 = vmatprep.subr.bf16.mxu0 %v4302_v38  ;;  %2737 = vmatprep.subr.bf16.mxu1 %v4305_v41  ;;  %v4451_v48 = vld [vmem:[#allocation5] sm:$0xff]   ;;  %v4452_v38 = vld [vmem:[#allocation5 + $0x48] sm:$0xff]  }
 0x1b9   : > { %v4357_v41 = vld [vmem:[%s6135_s3 + $0x40] ss:$24 sps:$4 sm:$0xff]  }
 0x1bb   : > { %2656 = vmatpush1.bf16.msra.mxu0 %v4300_v10  ;;  %2738 = vmatpush1.bf16.msra.mxu1 %v4303_v7  ;;  %v4362_v10 = vld [vmem:[%s6135_s3 + $0x74] ss:$24 sps:$4 sm:$0xff]  }
 0x1bc   : > { %2657 = vmatprep.subr.bf16.mxu0 %v4308_v17  ;;  %2739 = vmatprep.subr.bf16.mxu1 %v4311_v43  ;;  %v4453_v7 = vld [vmem:[#allocation5 + $0x8] sm:$0xff]   ;;  %v4454_v17 = vld [vmem:[#allocation5 + $0x50] sm:$0xff]  }
 0x1bd   : > { %v4360_v43 = vld [vmem:[%s6135_s3 + $0x70] ss:$24 sps:$4 sm:$0xff]  }
 0x1bf   : > { %2658 = vmatpush1.bf16.msra.mxu0 %v4306_v45  ;;  %2740 = vmatpush1.bf16.msra.mxu1 %v4309_v22  ;;  %v4455_v45 = vld [vmem:[#allocation5 + $0x10] sm:$0xff]   ;;  %v4456_v22 = vld [vmem:[#allocation5 + $0x58] sm:$0xff]  }
 0x1c0   : > { %2659 = vmatprep.subr.bf16.mxu0 %v4314_v26  ;;  %2741 = vmatprep.subr.bf16.mxu1 %v4317_v8  ;;  %v4363_v26 = vld [vmem:[%s6135_s3 + $0xa0] ss:$24 sps:$4 sm:$0xff]   ;;  %v4368_v8 = vld [vmem:[%s6135_s3 + $0xd4] ss:$24 sps:$4 sm:$0xff]  }
 0x1c3   : > { %2660 = vmatpush1.bf16.msra.mxu0 %v4312_v11  ;;  %2742 = vmatpush1.bf16.msra.mxu1 %v4315_v49  ;;  %v4457_v11 = vld [vmem:[#allocation5 + $0x18] sm:$0xff]   ;;  %v4458_v49 = vld [vmem:[#allocation5 + $0x60] sm:$0xff]  }
 0x1c4   : > { %2661 = vmatprep.subr.bf16.mxu0 %v4320_v50  ;;  %2743 = vmatprep.subr.bf16.mxu1 %v4323_v18  ;;  %v4366_v50 = vld [vmem:[%s6135_s3 + $0xd0] ss:$24 sps:$4 sm:$0xff]   ;;  %v4371_v18 = vld [vmem:[%s6135_s3 + $0x104] ss:$24 sps:$4 sm:$0xff]  }
 0x1c7   : > { %2662 = vmatpush1.bf16.msra.mxu0 %v4318_v61  ;;  %2744 = vmatpush1.bf16.msra.mxu1 %v4321_v5  ;;  %v4459_v61 = vld [vmem:[#allocation5 + $0x20] sm:$0xff]   ;;  %v4460_v5 = vld [vmem:[#allocation5 + $0x68] sm:$0xff]  }
 0x1c8   : > { %2663 = vmatprep.subr.bf16.mxu0 %v4326_v14  ;;  %2745 = vmatprep.subr.bf16.mxu1 %v4329_v40  ;;  %v4369_v14 = vld [vmem:[%s6135_s3 + $0x100] ss:$24 sps:$4 sm:$0xff]   ;;  %v4374_v40 = vld [vmem:[%s6135_s3 + $0x134] ss:$24 sps:$4 sm:$0xff]  }
 0x1c9   : > { %v1376_v46 = vpop.f32.mrb[4].mxu1 }
 0x1ca   : > { %v1407_v44 = vadd.f32 %v1399_v21, %v1376_v46  ;;  %v4070_v62 = vpop.f32.mrb[5].mxu1  ;;  %v4461_v21 = vld [vmem:[#allocation5 + $0x28] sm:$0xff]  }
 0x1cb   : > { %2664 = vmatpush1.bf16.msra.mxu0 %v4324_v35  ;;  %2746 = vmatpush1.bf16.msra.mxu1 %v4327_v2  ;;  %v1379_v52 = vpop.f32.mrb[6].mxu1  ;;  %v4372_v35 = vld [vmem:[%s6135_s3 + $0x130] ss:$24 sps:$4 sm:$0xff]   ;;  %v4377_v2 = vld [vmem:[%s6135_s3 + $0x164] ss:$24 sps:$4 sm:$0xff]  }
 0x1cc   : > { %2665 = vmatprep.subr.bf16.mxu0 %v4332_v3  ;;  %2747 = vmatprep.subr.bf16.mxu1 %v4335_v32  ;;  %v1411_v20 = vmax.f32 %v1407_v44, 0.0  ;;  %v4071_v30 = vpop.f32.mrb[7].mxu1  ;;  %v4375_v3 = vld [vmem:[%s6135_s3 + $0x160] ss:$24 sps:$4 sm:$0xff]   ;;  %v4380_v32 = vld [vmem:[%s6135_s3 + $0x194] ss:$24 sps:$4 sm:$0xff]  }
 0x1cd   : > { %v4378_v46 = vld [vmem:[%s6135_s3 + $0x190] ss:$24 sps:$4 sm:$0xff]   ;;  %v4383_v44 = vld [vmem:[%s6135_s3 + $0x1c4] ss:$24 sps:$4 sm:$0xff]   ;;  %v4381_v62 = vld [vmem:[%s6135_s3 + $0x1c0] ss:$24 sps:$4 sm:$0xff]  }
 0x1ce   : > { %v5823_v31 = vpack.c.bf16 %v1411_v20, %v1411_v20  ;;  %v4389_v52 = vld [vmem:[%s6135_s3 + $0x224] ss:$24 sps:$4 sm:$0xff]   ;;  %v4390_v20 = vld [vmem:[%s6135_s3 + $0x250] ss:$24 sps:$4 sm:$0xff]  }
 0x1cf   : > { %2666 = vmatpush1.bf16.msra.mxu0 %v4330_v24  ;;  %2748 = vmatpush1.bf16.msra.mxu1 %v4333_v60  ;;  %v4386_v24 = vld [vmem:[%s6135_s3 + $0x1f4] ss:$24 sps:$4 sm:$0xff]   ;;  %v4384_v60 = vld [vmem:[%s6135_s3 + $0x1f0] ss:$24 sps:$4 sm:$0xff]   ;;  %v4395_v30 = vld [vmem:[%s6135_s3 + $0x284] ss:$24 sps:$4 sm:$0xff]  }
 0x1d0   : > { %2667 = vmatprep.subr.bf16.mxu0 %v4338_v27  ;;  %2749 = vmatprep.subr.bf16.mxu1 %v4341_v25  ;;  %v4387_v27 = vld [vmem:[%s6135_s3 + $0x220] ss:$24 sps:$4 sm:$0xff]   ;;  %v4392_v25 = vld [vmem:[%s6135_s3 + $0x254] ss:$24 sps:$4 sm:$0xff]  }
 0x1d1   : > { %2673 = vmatprep.mubr.bf16.mxu0 %v5823_v31  ;;  %2755 = vmatprep.mubr.bf16.mxu1 %v5823_v31 }
 0x1d3   : > { %2668 = vmatpush1.bf16.msra.mxu0 %v4336_v47  ;;  %2750 = vmatpush1.bf16.msra.mxu1 %v4339_v56  ;;  %v4393_v47 = vld [vmem:[%s6135_s3 + $0x280] ss:$24 sps:$4 sm:$0xff]   ;;  %v4398_v56 = vld [vmem:[%s6135_s3 + $0x2b4] ss:$24 sps:$4 sm:$0xff]  }
 0x1d4   : > { %2669 = vmatprep.subr.bf16.mxu0 %v4344_v19  ;;  %2751 = vmatprep.subr.bf16.mxu1 %v4347_v33  ;;  %v4396_v19 = vld [vmem:[%s6135_s3 + $0x2b0] ss:$24 sps:$4 sm:$0xff]   ;;  %v4401_v33 = vld [vmem:[%s6135_s3 + $0x2e4] ss:$24 sps:$4 sm:$0xff]  }
 0x1d7   : > { %2670 = vmatpush1.bf16.msra.mxu0 %v4342_v29  ;;  %2752 = vmatpush1.bf16.msra.mxu1 %v4345_v4  ;;  %v4399_v29 = vld [vmem:[%s6135_s3 + $0x2e0] ss:$24 sps:$4 sm:$0xff]   ;;  %v4404_v4 = vld [vmem:[%s6135_s3 + $0x314] ss:$24 sps:$4 sm:$0xff]  }
 0x1d8   : > { %2671 = vmatprep.subr.bf16.mxu0 %v4350_v51  ;;  %2753 = vmatprep.subr.bf16.mxu1 %v4353_v53  ;;  %v4402_v51 = vld [vmem:[%s6135_s3 + $0x310] ss:$24 sps:$4 sm:$0xff]   ;;  %v4407_v53 = vld [vmem:[%s6135_s3 + $0x344] ss:$24 sps:$4 sm:$0xff]  }
 0x1db   : > { %2672 = vmatpush1.bf16.msra.mxu0 %v4348_v0  ;;  %2754 = vmatpush1.bf16.msra.mxu1 %v4351_v63  ;;  %v4405_v0 = vld [vmem:[%s6135_s3 + $0x340] ss:$24 sps:$4 sm:$0xff]   ;;  %v4410_v63 = vld [vmem:[%s6135_s3 + $0x374] ss:$24 sps:$4 sm:$0xff]  }
 0x1dc   : > { %2764 = vmatprep.subr.bf16.mxu0 %v4356_v9  ;;  %3926 = vmatprep.subr.bf16.mxu1 %v4450_v16  ;;  %v4408_v9 = vld [vmem:[%s6135_s3 + $0x370] ss:$24 sps:$4 sm:$0xff]   ;;  %v4464_v16 = vld [vmem:[#allocation5 + $0x78] sm:$0xff]  }
 0x1e1   : > { %v1303_v55 = vpop.f32.mrb[4].mxu0 }
 0x1e2   : > { %v1406_v39 = vadd.f32 %v1395_v15, %v1303_v55  ;;  %v4050_v36 = vpop.f32.mrb[5].mxu0  ;;  %v4416_v15 = vld [vmem:[%s6135_s3 + $0x3d4] ss:$24 sps:$4 sm:$0xff]   ;;  %v4414_v55 = vld [vmem:[%s6135_s3 + $0x3d0] ss:$24 sps:$4 sm:$0xff]  }
 0x1e3   : > { %v1306_v57 = vpop.f32.mrb[6].mxu0  ;;  %v4417_v36 = vld [vmem:[%s6135_s3 + $0x400] ss:$24 sps:$4 sm:$0xff]  }
 0x1e4   : > { %v1410_v6 = vmax.f32 %v1406_v39, 0.0  ;;  %v4051_v59 = vpop.f32.mrb[7].mxu0  ;;  %v4419_v39 = vld [vmem:[%s6135_s3 + $0x404] ss:$24 sps:$4 sm:$0xff]   ;;  %v4422_v57 = vld [vmem:[%s6135_s3 + $0x434] ss:$24 sps:$4 sm:$0xff]  }
 0x1e5   : > { %v4463_v59 = vld [vmem:[#allocation5 + $0x30] sm:$0xff]  }
 0x1e6   : > { %v5867_v58 = vpack.c.bf16 %v1410_v6, %v1410_v6  ;;  %v4462_v6 = vld [vmem:[#allocation5 + $0x70] sm:$0xff]  }
 0x1e8   : > { %2674 = vmatmul.mubr.bf16.vlgmr.msra.gmra.mrb[8].mxu0 %v5867_v58  ;;  %2756 = vmatmul.mubr.bf16.vlgmr.msra.gmra.mrb[8].mxu1 %v5867_v58 }
 0x1e9   : > { %2765 = vmatpush1.bf16.msra.mxu0 %v4354_v13  ;;  %2796 = vmatprep.mubr.bf16.mxu0 %v5657_v54  ;;  %v4365_v54 = vld [vmem:[%s6135_s3 + $0xa4] ss:$24 sps:$4 sm:$0xff]   ;;  %v4420_v13 = vld [vmem:[%s6135_s3 + $0x430] ss:$24 sps:$4 sm:$0xff]  }
 0x1ea   : > { %2766 = vmatprep.subr.bf16.mxu0 %v4359_v37  ;;  %3927 = vmatpush3.bf16.msra.mxu1 %v4451_v48  ;;  %v4425_v37 = vld [vmem:[%s6135_s3 + $0x464] ss:$24 sps:$4 sm:$0xff]  }
 0x1eb   : > { %3928 = vmatprep.subr.bf16.mxu1 %v4452_v38  ;;  %v4465_v48 = vld [vmem:[#allocation5 + $0x38] sm:$0xff]  }
 0x1ec   : > { %v4423_v38 = vld [vmem:[%s6135_s3 + $0x460] ss:$24 sps:$4 sm:$0xff]  }
 0x1ed   : > { %2767 = vmatpush1.bf16.msra.mxu0 %v4357_v41  ;;  %v4428_v41 = vld [vmem:[%s6135_s3 + $0x494] ss:$24 sps:$4 sm:$0xff]  }
 0x1ee   : > { %2768 = vmatprep.subr.bf16.mxu0 %v4362_v10  ;;  %3929 = vmatpush3.bf16.msra.mxu1 %v4453_v7  ;;  %v4466_v10 = vld [vmem:[#allocation5 + $0xc0] sm:$0xff]   ;;  %v4426_v7 = vld [vmem:[%s6135_s3 + $0x490] ss:$24 sps:$4 sm:$0xff]  }
 0x1ef   : > { %3930 = vmatprep.subr.bf16.mxu1 %v4454_v17  ;;  %v4431_v17 = vld [vmem:[%s6135_s3 + $0x4c4] ss:$24 sps:$4 sm:$0xff]  }
 0x1f1   : > { %2769 = vmatpush1.bf16.msra.mxu0 %v4360_v43  ;;  %v4429_v43 = vld [vmem:[%s6135_s3 + $0x4c0] ss:$24 sps:$4 sm:$0xff]  }
 0x1f2   : > { %2770 = vmatprep.subr.bf16.mxu0 %v4365_v54  ;;  %3931 = vmatpush3.bf16.msra.mxu1 %v4455_v45  ;;  %v4434_v54 = vld [vmem:[%s6135_s3 + $0x4f4] ss:$24 sps:$4 sm:$0xff]   ;;  %v4432_v45 = vld [vmem:[%s6135_s3 + $0x4f0] ss:$24 sps:$4 sm:$0xff]  }
 0x1f3   : > { %3932 = vmatprep.subr.bf16.mxu1 %v4456_v22  ;;  %v4437_v22 = vld [vmem:[%s6135_s3 + $0x524] ss:$24 sps:$4 sm:$0xff]  }
 0x1f5   : > { %2771 = vmatpush1.bf16.msra.mxu0 %v4363_v26  ;;  %v4435_v26 = vld [vmem:[%s6135_s3 + $0x520] ss:$24 sps:$4 sm:$0xff]  }
 0x1f6   : > { %2772 = vmatprep.subr.bf16.mxu0 %v4368_v8  ;;  %3933 = vmatpush3.bf16.msra.mxu1 %v4457_v11  ;;  %v4440_v8 = vld [vmem:[%s6135_s3 + $0x554] ss:$24 sps:$4 sm:$0xff]   ;;  %v4438_v11 = vld [vmem:[%s6135_s3 + $0x550] ss:$24 sps:$4 sm:$0xff]  }
 0x1f7   : > { %3934 = vmatprep.subr.bf16.mxu1 %v4458_v49  ;;  %v4443_v49 = vld [vmem:[%s6135_s3 + $0x584] ss:$24 sps:$4 sm:$0xff]  }
 0x1f9   : > { %2773 = vmatpush1.bf16.msra.mxu0 %v4366_v50  ;;  %v4441_v50 = vld [vmem:[%s6135_s3 + $0x580] ss:$24 sps:$4 sm:$0xff]  }
 0x1fa   : > { %2774 = vmatprep.subr.bf16.mxu0 %v4371_v18  ;;  %3935 = vmatpush3.bf16.msra.mxu1 %v4459_v61  ;;  %v4446_v18 = vld [vmem:[%s6135_s3 + $0x5b4] ss:$24 sps:$4 sm:$0xff]   ;;  %v4444_v61 = vld [vmem:[%s6135_s3 + $0x5b0] ss:$24 sps:$4 sm:$0xff]  }
 0x1fb   : > { %3936 = vmatprep.subr.bf16.mxu1 %v4460_v5  ;;  %v4449_v5 = vld [vmem:[%s6135_s3 + $0x5e4] ss:$24 sps:$4 sm:$0xff]  }
 0x1fd   : > { %2775 = vmatpush1.bf16.msra.mxu0 %v4369_v14  ;;  %v4447_v14 = vld [vmem:[%s6135_s3 + $0x5e0] ss:$24 sps:$4 sm:$0xff]  }
 0x1fe   : > { %2776 = vmatprep.subr.bf16.mxu0 %v4374_v40  ;;  %3937 = vmatpush3.bf16.msra.mxu1 %v4461_v21  ;;  %v6064_v40 = vld [vmem:[%s6136_s4] sm:$0x3f] }
 0x1ff   : > { %3938 = vmatprep.subr.bf16.mxu1 %v4462_v6  ;;  %v1613_v21 = vrot.slane %v6064_v40, %v1386_v12 }
 0x201   : > { %2777 = vmatpush1.bf16.msra.mxu0 %v4372_v35  ;;  %v1617_v35 = vrot.slane %v6064_v40, %v1390_v42  ;;  %v4467_v42 = vld [vmem:[#allocation5 + $0x80] sm:$0xff]  }
 0x202   : > { %2778 = vmatprep.subr.bf16.mxu0 %v4377_v2  ;;  %3939 = vmatpush3.bf16.msra.mxu1 %v4463_v59  ;;  %v1625_v2 = vrot.slane %v6064_v40, %v1398_v34  ;;  %v4469_v34 = vld [vmem:[#allocation5 + $0x88] sm:$0xff]   ;;  %v4482_v59 = vld [vmem:[#allocation5 + $0x140] sm:$0xff]  }
 0x203   : > { %3940 = vmatprep.subr.bf16.mxu1 %v4464_v16  ;;  %v4484_v16 = vld [vmem:[#allocation5 + $0x148] sm:$0xff]  }
 0x205   : > { %2779 = vmatpush1.bf16.msra.mxu0 %v4375_v3 }
 0x206   : > { %2780 = vmatprep.subr.bf16.mxu0 %v4380_v32  ;;  %3941 = vmatpush3.bf16.msra.mxu1 %v4465_v48  ;;  %v4486_v48 = vld [vmem:[#allocation5 + $0x150] sm:$0xff]  }
 0x207   : > { %3948 = vmatprep.subr.bf16.mxu1 %v4466_v10  ;;  %v4489_v10 = vld [vmem:[#allocation5 + $0x118] sm:$0xff]  }
 0x209   : > { %2781 = vmatpush1.bf16.msra.mxu0 %v4378_v46 }
 0x20a   : > { %2782 = vmatprep.subr.bf16.mxu0 %v4383_v44 }
 0x20d   : > { %2783 = vmatpush1.bf16.msra.mxu0 %v4381_v62 }
 0x20e   : > { %2784 = vmatprep.subr.bf16.mxu0 %v4386_v24 }
 0x211   : > { %2785 = vmatpush1.bf16.msra.mxu0 %v4384_v60 }
 0x212   : > { %2786 = vmatprep.subr.bf16.mxu0 %v4389_v52 }
 0x215   : > { %2787 = vmatpush1.bf16.msra.mxu0 %v4387_v27 }
 0x216   : > { %2788 = vmatprep.subr.bf16.mxu0 %v4392_v25 }
 0x219   : > { %2789 = vmatpush1.bf16.msra.mxu0 %v4390_v20 }
 0x21a   : > { %2790 = vmatprep.subr.bf16.mxu0 %v4395_v30 }
 0x21d   : > { %2791 = vmatpush1.bf16.msra.mxu0 %v4393_v47 }
 0x21e   : > { %2792 = vmatprep.subr.bf16.mxu0 %v4398_v56 }
 0x221   : > { %2793 = vmatpush1.bf16.msra.mxu0 %v4396_v19  ;;  %v4468_v19 = vld [vmem:[#allocation5 + $0xc8] sm:$0xff]  }
 0x222   : > { %2794 = vmatprep.subr.bf16.mxu0 %v4401_v33 }
 0x225   : > { %2795 = vmatpush1.bf16.msra.mxu0 %v4399_v29  ;;  %v4470_v29 = vld [vmem:[#allocation5 + $0xd0] sm:$0xff]  }
 0x226   : > { %2805 = vmatprep.subr.bf16.mxu0 %v4404_v4  ;;  %v4471_v4 = vld [vmem:[#allocation5 + $0x90] sm:$0xff]  }
 0x228   : > { %2797 = vmatmul.mubr.bf16.vlgmr.msra.gmra.mrb[12].mxu0 %v5655_v1  ;;  %v4413_v1 = vld [vmem:[%s6135_s3 + $0x3a4] ss:$24 sps:$4 sm:$0xff]  }
 0x229   : > { %2806 = vmatpush1.bf16.msra.mxu0 %v4402_v51  ;;  %2837 = vmatprep.mubr.bf16.mxu0 %v5823_v31  ;;  %v4411_v31 = vld [vmem:[%s6135_s3 + $0x3a0] ss:$24 sps:$4 sm:$0xff]  }
 0x22a   : > { %2807 = vmatprep.subr.bf16.mxu0 %v4407_v53  ;;  %v4472_v51 = vld [vmem:[#allocation5 + $0xd8] sm:$0xff]  }
 0x22b   : > { %v4473_v53 = vld [vmem:[#allocation5 + $0x98] sm:$0xff]  }
 0x22d   : > { %2808 = vmatpush1.bf16.msra.mxu0 %v4405_v0  ;;  %v4474_v0 = vld [vmem:[#allocation5 + $0xe0] sm:$0xff]  }
 0x22e   : > { %2809 = vmatprep.subr.bf16.mxu0 %v4410_v63  ;;  %v4475_v63 = vld [vmem:[#allocation5 + $0xa0] sm:$0xff]  }
 0x231   : > { %2810 = vmatpush1.bf16.msra.mxu0 %v4408_v9  ;;  %v4476_v9 = vld [vmem:[#allocation5 + $0xe8] sm:$0xff]  }
 0x232   : > { %2811 = vmatprep.subr.bf16.mxu0 %v4413_v1  ;;  %v4477_v1 = vld [vmem:[#allocation5 + $0xa8] sm:$0xff]  }
 0x235   : > { %2812 = vmatpush1.bf16.msra.mxu0 %v4411_v31  ;;  %v1621_v31 = vrot.slane %v6064_v40, %v1394_v23  ;;  %v4485_v23 = vld [vmem:[#allocation5 + $0x108] sm:$0xff]  }
 0x236   : > { %2813 = vmatprep.subr.bf16.mxu0 %v4416_v15  ;;  %v4478_v15 = vld [vmem:[#allocation5 + $0xf0] sm:$0xff]  }
 0x239   : > { %2814 = vmatpush1.bf16.msra.mxu0 %v4414_v55  ;;  %v4479_v55 = vld [vmem:[#allocation5 + $0xb0] sm:$0xff]  }
 0x23a   : > { %2815 = vmatprep.subr.bf16.mxu0 %v4419_v39 }
 0x23d   : > { %2816 = vmatpush1.bf16.msra.mxu0 %v4417_v36  ;;  %v4480_v36 = vld [vmem:[#allocation5 + $0xf8] sm:$0xff]  }
 0x23e   : > { %2817 = vmatprep.subr.bf16.mxu0 %v4422_v57  ;;  %v4481_v57 = vld [vmem:[#allocation5 + $0xb8] sm:$0xff]  }
 0x241   : > { %2818 = vmatpush1.bf16.msra.mxu0 %v4420_v13  ;;  %v4483_v13 = vld [vmem:[#allocation5 + $0x100] sm:$0xff]  }
 0x242   : > { %2819 = vmatprep.subr.bf16.mxu0 %v4425_v37 }
 0x245   : > { %2820 = vmatpush1.bf16.msra.mxu0 %v4423_v38  ;;  %v4487_v38 = vld [vmem:[#allocation5 + $0x110] sm:$0xff]  }
 0x246   : > { %2821 = vmatprep.subr.bf16.mxu0 %v4428_v41  ;;  %v4488_v41 = vld [vmem:[#allocation5 + $0x158] sm:$0xff]  }
 0x249   : > { %2822 = vmatpush1.bf16.msra.mxu0 %v4426_v7  ;;  %v4490_v7 = vld [vmem:[#allocation5 + $0x160] sm:$0xff]  }
 0x24a   : > { %2823 = vmatprep.subr.bf16.mxu0 %v4431_v17  ;;  %v4491_v17 = vld [vmem:[#allocation5 + $0x120] sm:$0xff]  }
 0x24d   : > { %2824 = vmatpush1.bf16.msra.mxu0 %v4429_v43  ;;  %v4492_v43 = vld [vmem:[#allocation5 + $0x168] sm:$0xff]  }
 0x24e   : > { %2825 = vmatprep.subr.bf16.mxu0 %v4434_v54  ;;  %v4493_v54 = vld [vmem:[#allocation5 + $0x128] sm:$0xff]  }
 0x251   : > { %2826 = vmatpush1.bf16.msra.mxu0 %v4432_v45  ;;  %v4494_v45 = vld [vmem:[#allocation5 + $0x170] sm:$0xff]  }
 0x252   : > { %2827 = vmatprep.subr.bf16.mxu0 %v4437_v22  ;;  %v4495_v22 = vld [vmem:[#allocation5 + $0x130] sm:$0xff]  }
 0x255   : > { %2828 = vmatpush1.bf16.msra.mxu0 %v4435_v26  ;;  %v4496_v26 = vld [vmem:[#allocation5 + $0x178] sm:$0xff]  }
 0x256   : > { %2829 = vmatprep.subr.bf16.mxu0 %v4440_v8  ;;  %v4497_v8 = vld [vmem:[#allocation5 + $0x138] sm:$0xff]  }
 0x259   : > { %2830 = vmatpush1.bf16.msra.mxu0 %v4438_v11  ;;  %v1628_v11 = vsub.s32 4, %v5640_v28 }
 0x25a   : > { %2831 = vmatprep.subr.bf16.mxu0 %v4443_v49  ;;  %v1632_v49 = vsub.s32 5, %v5640_v28 }
 0x25d   : > { %2832 = vmatpush1.bf16.msra.mxu0 %v4441_v50  ;;  %v1629_v50 = vrot.slane %v6064_v40, %v1628_v11 }
 0x25e   : > { %2833 = vmatprep.subr.bf16.mxu0 %v4446_v18  ;;  %v1633_v18 = vrot.slane %v6064_v40, %v1632_v49  ;;  %v3677_v40 = vld [vmem:[%s6138_s6] ss:$0 sm:$0xff] }
 0x261   : > { %2834 = vmatpush1.bf16.msra.mxu0 %v4444_v61 }
 0x262   : > { %2835 = vmatprep.subr.bf16.mxu0 %v4449_v5 }
 0x265   : > { %2836 = vmatpush1.bf16.msra.mxu0 %v4447_v14 }
 0x268   : > { %2838 = vmatmul.mubr.bf16.vlgmr.msra.gmra.mrb[12].mxu0 %v5867_v58 }
 0x2bb   : > { %v2675_v3 = vpop.f32.mrb[8].mxu0  ;;  %v2757_v32 = vpop.f32.mrb[8].mxu1 }
 0x2bc   : > { %v4072_v58 = vadd.f32 %v2675_v3, %v1613_v21  ;;  %v2677_v46 = vpop.f32.mrb[9].mxu0  ;;  %v2759_v44 = vpop.f32.mrb[9].mxu1  ;;  %v4074_v39 = vadd.f32 %v2757_v32, %v1621_v31 }
 0x2bd   : > { %v4073_v62 = vadd.f32 %v2677_v46, %v1617_v35  ;;  %v4075_v24 = vadd.f32 %v2759_v44, %v1625_v2  ;;  %v2679_v60 = vpop.f32.mrb[10].mxu0  ;;  %v2761_v52 = vpop.f32.mrb[10].mxu1 }
 0x2be   : > { %v2846_v27 = vmax.f32 %v4072_v58, 0.0  ;;  %v2680_v25 = vpop.f32.mrb[11].mxu0  ;;  %v2762_v12 = vpop.f32.mrb[11].mxu1  ;;  %v2848_v6 = vmax.f32 %v4074_v39, 0.0 }
 0x2bf   : > { %v2847_v20 = vmax.f32 %v4073_v62, 0.0  ;;  %v2849_v30 = vmax.f32 %v4075_v24, 0.0 }
 0x2c0   : > { %v2852_v56 = vpack.c.bf16 %v2846_v27, %v2846_v27  ;;  %v2854_v37 = vpack.c.bf16 %v2848_v6, %v2848_v6 }
 0x2c1   : > { %v2853_v47 = vpack.c.bf16 %v2847_v20, %v2847_v20  ;;  %v2855_v33 = vpack.c.bf16 %v2849_v30, %v2849_v30 }
 0x2c3   : > { %3281 = vmatprep.mubr.bf16.mxu1 %v2853_v47 }
 0x2c4   : > { %3282 = vmatmul.mubr.bf16.vlgmr.msra.gmra.mrb[12].mxu1 %v2852_v56 }
 0x2c5   : > { %3949 = vmatpush3.bf16.msra.mxu1 %v4467_v42  ;;  %3321 = vmatprep.mubr.bf16.mxu1 %v2855_v33 }
 0x2c6   : > { %3950 = vmatprep.subr.bf16.mxu1 %v4468_v19 }
 0x2c9   : > { %3951 = vmatpush3.bf16.msra.mxu1 %v4469_v34 }
 0x2ca   : > { %3952 = vmatprep.subr.bf16.mxu1 %v4470_v29 }
 0x2cd   : > { %3953 = vmatpush3.bf16.msra.mxu1 %v4471_v4 }
 0x2ce   : > { %3954 = vmatprep.subr.bf16.mxu1 %v4472_v51 }
 0x2d1   : > { %3955 = vmatpush3.bf16.msra.mxu1 %v4473_v53 }
 0x2d2   : > { %3956 = vmatprep.subr.bf16.mxu1 %v4474_v0 }
 0x2d5   : > { %3957 = vmatpush3.bf16.msra.mxu1 %v4475_v63 }
 0x2d6   : > { %3958 = vmatprep.subr.bf16.mxu1 %v4476_v9 }
 0x2d9   : > { %3959 = vmatpush3.bf16.msra.mxu1 %v4477_v1 }
 0x2da   : > { %3960 = vmatprep.subr.bf16.mxu1 %v4478_v15 }
 0x2dd   : > { %3961 = vmatpush3.bf16.msra.mxu1 %v4479_v55 }
 0x2de   : > { %3962 = vmatprep.subr.bf16.mxu1 %v4480_v36 }
 0x2e1   : > { %3963 = vmatpush3.bf16.msra.mxu1 %v4481_v57 }
 0x2e2   : > { %3970 = vmatprep.subr.bf16.mxu1 %v4482_v59 }
 0x2e4   : > { %3322 = vmatmul.mubr.bf16.vlgmr.msra.gmra.mrb[16].mxu1 %v2854_v37 }
 0x2e5   : > { %3971 = vmatpush3.bf16.msra.mxu1 %v4483_v13 }
 0x2e6   : > { %3972 = vmatprep.subr.bf16.mxu1 %v4484_v16 }
 0x2e9   : > { %3973 = vmatpush3.bf16.msra.mxu1 %v4485_v23 }
 0x2ea   : > { %3974 = vmatprep.subr.bf16.mxu1 %v4486_v48 }
 0x2ed   : > { %3975 = vmatpush3.bf16.msra.mxu1 %v4487_v38 }
 0x2ee   : > { %3976 = vmatprep.subr.bf16.mxu1 %v4488_v41 }
 0x2f1   : > { %3977 = vmatpush3.bf16.msra.mxu1 %v4489_v10 }
 0x2f2   : > { %3978 = vmatprep.subr.bf16.mxu1 %v4490_v7 }
 0x2f5   : > { %3979 = vmatpush3.bf16.msra.mxu1 %v4491_v17 }
 0x2f6   : > { %3980 = vmatprep.subr.bf16.mxu1 %v4492_v43 }
 0x2f9   : > { %3981 = vmatpush3.bf16.msra.mxu1 %v4493_v54 }
 0x2fa   : > { %3982 = vmatprep.subr.bf16.mxu1 %v4494_v45 }
 0x2fd   : > { %3983 = vmatpush3.bf16.msra.mxu1 %v4495_v22 }
 0x2fe   : > { %3984 = vmatprep.subr.bf16.mxu1 %v4496_v26 }
 0x301   : > { %3985 = vmatpush3.bf16.msra.mxu1 %v4497_v8 }
 0x33b   : > { %v2839_v61 = vpop.f32.mrb[12].mxu0 }
 0x33c   : > { %v4076_v5 = vadd.f32 %v2839_v61, %v1629_v50  ;;  %v2841_v14 = vpop.f32.mrb[13].mxu0 }
 0x33d   : > { %v4077_v21 = vadd.f32 %v2841_v14, %v1633_v18  ;;  %v2843_v35 = vpop.f32.mrb[14].mxu0 }
 0x33e   : > { %v2850_v2 = vmax.f32 %v4076_v5, 0.0  ;;  %v2844_v3 = vpop.f32.mrb[15].mxu0 }
 0x33f   : > { %v2851_v32 = vmax.f32 %v4077_v21, 0.0 }
 0x340   : > { %v2856_v46 = vpack.c.bf16 %v2850_v2, %v2850_v2 }
 0x341   : > { %v2857_v58 = vpack.c.bf16 %v2851_v32, %v2851_v32 }
 0x343   : > { %3361 = vmatprep.mubr.bf16.mxu1 %v2857_v58 }
 0x344   : > { %3362 = vmatmul.mubr.bf16.vlgmr.msra.gmra.mrb[20].mxu1 %v2856_v46 }
 0x397   : > { %v3942_v44 = vpop.f32.mrb[12].mxu1 }
 0x398   : > { %v3943_v62 = vpop.f32.mrb[13].mxu1 }
 0x399   : > { %v3944_v28 = vadd.f32 %v3943_v62, %v3942_v44  ;;  %v3945_v24 = vpop.f32.mrb[14].mxu1 }
 0x39a   : > { %v3946_v60 = vpop.f32.mrb[15].mxu1 }
 0x39b   : > { %v3284_v25 = vadd.f32 %v3944_v28, %v3677_v40 }
 0x3b7   : > { %v3964_v52 = vpop.f32.mrb[16].mxu1 }
 0x3b8   : > { %v3965_v27 = vpop.f32.mrb[17].mxu1 }
 0x3b9   : > { %v3966_v12 = vadd.f32 %v3965_v27, %v3964_v52  ;;  %v3967_v20 = vpop.f32.mrb[18].mxu1 }
 0x3ba   : > { %v3968_v30 = vpop.f32.mrb[19].mxu1 }
 0x3bb   : > { %v3324_v47 = vadd.f32 %v3966_v12, %v3284_v25 }
 0x417   : > { %v3986_v42 = vpop.f32.mrb[20].mxu1 }
 0x418   : > { %v3987_v56 = vpop.f32.mrb[21].mxu1 }
 0x419   : > { %v3988_v19 = vadd.f32 %v3987_v56, %v3986_v42  ;;  %v3989_v33 = vpop.f32.mrb[22].mxu1 }
 0x41a   : > { %v3990_v34 = vpop.f32.mrb[23].mxu1 }
 0x41b   : > { %v3364_v29 = vadd.f32 %v3988_v19, %v3324_v47 }
 0x41d   : > { %3369 = vst [vmem:[%s304_s23] sm:$0xff] %v3364_v29 }
 0x41e   : > { %4575 = shalt.err (!%p4572_p11)
}
 0x41f   : > { %s4576_s18 = scalar_lea.hbm %s6090_s15, 128  ;;  %s4580_s20 = scalar_lea.hbm %s6139_s7, 256 }
 0x420   : > { %p4577_p13 = scmp.ne.s32.totalorder %s6090_s15, %s4576_s18  ;;  %p4581_p6 = scmp.lt.u32.totalorder %s6090_s15, %s6139_s7 }
 0x421   : > { %p4582_p9 = scmp.lt.u32.totalorder %s4580_s20, %s4576_s18  ;;  %p4584_p10 = scmp.lt.u32.totalorder %s4576_s18, %s6090_s15 }
 0x422   : > { %p4578_p5 = pnand %p4577_p13, %p6196_p1 }
 0x423   : > { %p4583_p12 = por %p4582_p9, %p4581_p6 }
 0x424   : > { %p4579_p0 = pneg %p4578_p5 }
 0x425   : > { %p4585_p2 = por %p4584_p10, %p4583_p12 }
 0x427   : > { %p4586_p3 = pnand %p4585_p2, %p4579_p0 }
 0x429   : > { %4589 = shalt.err (!%p4586_p3)
}
 0x42a   : > { %4098 = dma.vmem_to_hbm [thread:$0]  (%p6196_p1), %s6092_s29, 128, %s6090_s15, %s3371_s10  }
 0x42b PF: > { %p4115_p4 = scmp.ge.s32.totalorder %s4632_s27, 2  ;;  %s3396_s23 = sand.u32 1, %s4620_s24  }
 0x42c   : > { %p6197_p7 = scmp.ne.s32.totalorder %s6154_s12, 0  ;;  %s3397_s8 = scalar_lea.sflag [#allocation4], %s3396_s23 }
 0x42e   : > { %p4108_p8 = pnand %p4115_p4, %p6197_p7 }
 0x430   : > { %4615 = dma.done.wait (!%p4108_p8), %s3397_s8, 128  }
 0x431   : > { %4617 = vsyncadd (!%p4108_p8), %s3397_s8, 4294967168  ;;  %s6198_s9 = sld [smem:[#allocation11_spill]]  ;;  %p19_p11 = scmp.ge.s32.totalorder %s4706_s30, 4  }
 0x432   : > { %s6199_s24 = smov %s4624_s25  ;;  %s6200_s25 = smov %s4628_s26 }
 0x433   : > { %s6202_s27 = smov %s4706_s30  ;;  %21 = sbr.rel (!%p19_p11) target bundleno = 5 (0x5), region = 92 }
 0x437   : > { %s6201_s26 = smov %s6198_s9 }
 0x43a   :  { %3402 = vsyncpa [#allocation3], 1 }
 0x43b   :  { %3404 = vsyncpa [#allocation3 + $0x1], 1 }
 0x43c   :  { %3405 = vsyncpa [#allocation6], 1 }
 0x43d   :  { %3406 = vsyncpa [#allocation4], 1 }
 0x43e   :  { %3408 = vsyncpa [#allocation4 + $0x1], 1 }

</bundles_post_ra>
